<compile_context>
chip_gen: v5e
topology: v5e:2x2
jax: 0.10.0
libtpu: 0.0.40
codegen_flags: <defaults>
</compile_context>

<pallas_src>
import functools
import math

import jax
import jax.numpy as jnp
from jax import lax
from jax.experimental import pallas as pl
from jax.experimental.pallas import tpu as pltpu


# --------------------------- tiling / compiler helpers ----------------------

def _tile(dim, pref):
    """Largest tile in {pref, pref/2, ..., 128} dividing dim, else the full dim."""
    t = pref
    while t >= 128:
        if dim % t == 0:
            return t
        t //= 2
    # TODO(synk): pad non-128-divisible dims (e.g. vocab=50257) instead of
    # falling back to a full-dimension block at real model sizes.
    return dim


@functools.lru_cache(maxsize=None)
def _vmem_limit_bytes():
    # Generation-aware scoped-VMEM limit: ~3/4 of physical per-core VMEM
    # (v7x 64 MiB -> 48 MiB; v5e/v6e 128 MiB -> 96 MiB).
    try:
        cap = int(pltpu.get_tpu_info().vmem_capacity_bytes)
    except Exception:
        return 64 * 1024 * 1024
    return max(32 * 1024 * 1024, (cap * 3) // 4)


def _cparams(dims):
    return pltpu.CompilerParams(dimension_semantics=dims,
                                vmem_limit_bytes=_vmem_limit_bytes())


_TM = 512        # row tile (multiple of 8/16)
_TN = 512        # output-column tile (multiple of 128, lane dense)
_TK = 512        # contraction tile (multiple of 128)
_TM_PROJ = 1024  # larger row tile for the vocab projection (stream wproj fewer times)
_TV = 512        # vocab tile


# ----------------------------- Pallas kernels ------------------------------

def _embed_pe_kernel(x_ref, pe_ref, o_ref, *, scale):
    # x*sqrt(d_model) + PE ; PE block is shared across the batch via the index_map.
    o_ref[0] = x_ref[0] * scale + pe_ref[...]


def _layernorm_math(x, alpha, beta, eps, d):
    # Tutorial LayerNorm: alpha*(x-mean)/(std+eps)+bias, std unbiased (/(D-1)).
    mean = jnp.mean(x, axis=-1, keepdims=True)
    c = x - mean
    var = jnp.sum(c * c, axis=-1, keepdims=True) * (1.0 / (d - 1))
    return alpha * c / (jnp.sqrt(var) + eps) + beta


def _ln_matmul_kernel(x_ref, a_ref, b_ref, w_ref, bias_ref, o_ref, h_ref,
                      *, eps, d, relu):
    # o = LN(x) @ W + bias [+ relu].  LN computed once per row tile (j==0) into a
    # bf16 VMEM scratch and reused for every output-column tile.
    @pl.when(pl.program_id(1) == 0)
    def _():
        h = _layernorm_math(x_ref[...], a_ref[...], b_ref[...], eps, d)
        h_ref[...] = h.astype(jnp.bfloat16)

    out = jnp.dot(h_ref[...], w_ref[...],
                  preferred_element_type=jnp.float32) + bias_ref[...]
    if relu:
        out = jnp.maximum(out, 0.0)
    o_ref[...] = out.astype(o_ref.dtype)


def _matmul_resid_kernel(x_ref, w_ref, bias_ref, r_ref, o_ref, acc_ref):
    # o = resid + x @ W + bias, K-axis tiled, f32 VMEM accumulator, bf16 operands.
    @pl.when(pl.program_id(2) == 0)
    def _():
        acc_ref[...] = jnp.zeros_like(acc_ref)

    acc_ref[...] += jnp.dot(x_ref[...], w_ref[...],
                            preferred_element_type=jnp.float32)

    @pl.when(pl.program_id(2) == pl.num_programs(2) - 1)
    def _():
        o_ref[...] = acc_ref[...] + bias_ref[...] + r_ref[...]


def _attention_kernel(q_ref, k_ref, v_ref, o_ref, *, scale):
    # One (batch, head) pair per grid step; q/k/v blocks are full (T, dk) bf16 tiles
    # (no unaligned lane slices, no head concatenate).
    # TODO(synk): flash-style KV tiling (online softmax) for long T on v7x.
    q = q_ref[0] * scale                          # (T, dk) bf16, pre-scaled
    k = k_ref[0]
    v = v_ref[0]
    s = lax.dot_general(q, k, (((1,), (1,)), ((), ())),
                        preferred_element_type=jnp.float32)          # (T, T) f32
    s = s - jnp.max(s, axis=-1, keepdims=True)
    p = jnp.exp(s)
    denom = jnp.sum(p, axis=-1, keepdims=True)
    p = (p * pl.reciprocal(denom, approx=True)).astype(v.dtype)      # bf16
    o_ref[0] = jnp.dot(p, v, preferred_element_type=jnp.float32).astype(o_ref.dtype)


def _layernorm_kernel(x_ref, a_ref, b_ref, o_ref, *, eps, d):
    # Final LN: computed exactly once per row, output bf16 for the projection matmuls.
    o_ref[...] = _layernorm_math(x_ref[...], a_ref[...], b_ref[...],
                                 eps, d).astype(o_ref.dtype)


def _proj_lse_kernel(h_ref, w_ref, b_ref, lse_ref, m_sc, l_sc):
    # Online logsumexp over vocab tiles of (h @ Wproj + b); only the (M,1) LSE is
    # written (logits are recomputed in the second sweep, never round-tripped).
    j = pl.program_id(1)

    @pl.when(j == 0)
    def _():
        m_sc[...] = jnp.full_like(m_sc, -jnp.inf)
        l_sc[...] = jnp.zeros_like(l_sc)

    logits = jnp.dot(h_ref[...], w_ref[...],
                     preferred_element_type=jnp.float32) + b_ref[...]
    m_prev = m_sc[...]
    m_new = jnp.maximum(m_prev, jnp.max(logits, axis=-1, keepdims=True))
    l_sc[...] = (l_sc[...] * jnp.exp(m_prev - m_new)
                 + jnp.sum(jnp.exp(logits - m_new), axis=-1, keepdims=True))
    m_sc[...] = m_new

    @pl.when(j == pl.num_programs(1) - 1)
    def _():
        lse_ref[...] = m_sc[...] + jnp.log(l_sc[...])


def _proj_sub_kernel(h_ref, w_ref, b_ref, lse_ref, o_ref):
    # log_softmax written in one pass: (h @ Wproj + b) - lse.
    logits = jnp.dot(h_ref[...], w_ref[...],
                     preferred_element_type=jnp.float32) + b_ref[...]
    o_ref[...] = logits - lse_ref[...]


# ----------------------------- Pallas wrappers ------------------------------

def embed_add_pe(emb, pe, scale):
    B, T, D = emb.shape
    tt = _tile(T, _TM)
    kern = functools.partial(_embed_pe_kernel, scale=scale)
    return pl.pallas_call(
        kern,
        out_shape=jax.ShapeDtypeStruct((B, T, D), jnp.float32),
        grid=(B, T // tt),
        in_specs=[
            pl.BlockSpec((1, tt, D), lambda b, i: (b, i, 0)),
            pl.BlockSpec((tt, D), lambda b, i: (i, 0)),   # PE shared across batch
        ],
        out_specs=pl.BlockSpec((1, tt, D), lambda b, i: (b, i, 0)),
        compiler_params=_cparams(("parallel", "parallel")),
    )(emb, pe)


def ln_matmul(x, alpha, beta, w, b, relu=False, eps=1e-6):
    M, D = x.shape
    N = w.shape[1]
    tm = _tile(M, _TM)
    tn = _tile(N, _TN)
    kern = functools.partial(_ln_matmul_kernel, eps=eps, d=D, relu=relu)
    return pl.pallas_call(
        kern,
        out_shape=jax.ShapeDtypeStruct((M, N), jnp.bfloat16),
        grid=(M // tm, N // tn),
        in_specs=[
            pl.BlockSpec((tm, D), lambda i, j: (i, 0)),   # full row for LN stats
            pl.BlockSpec((1, D), lambda i, j: (0, 0)),
            pl.BlockSpec((1, D), lambda i, j: (0, 0)),
            pl.BlockSpec((D, tn), lambda i, j: (0, j)),
            pl.BlockSpec((1, tn), lambda i, j: (0, j)),
        ],
        out_specs=pl.BlockSpec((tm, tn), lambda i, j: (i, j)),
        scratch_shapes=[pltpu.VMEM((tm, D), jnp.bfloat16)],
        # j must be "arbitrary": the LN scratch is filled at j==0 per row tile.
        compiler_params=_cparams(("parallel", "arbitrary")),
    )(x, alpha.reshape(1, D), beta.reshape(1, D), w, b.reshape(1, N))


def matmul_residual(x, w, b, resid):
    M, K = x.shape
    N = w.shape[1]
    tm = _tile(M, _TM)
    tn = _tile(N, _TN)
    tk = _tile(K, _TK)
    return pl.pallas_call(
        _matmul_resid_kernel,
        out_shape=jax.ShapeDtypeStruct((M, N), jnp.float32),
        grid=(M // tm, N // tn, K // tk),
        in_specs=[
            pl.BlockSpec((tm, tk), lambda i, j, k: (i, k)),
            pl.BlockSpec((tk, tn), lambda i, j, k: (k, j)),
            pl.BlockSpec((1, tn), lambda i, j, k: (0, j)),
            pl.BlockSpec((tm, tn), lambda i, j, k: (i, j)),
        ],
        out_specs=pl.BlockSpec((tm, tn), lambda i, j, k: (i, j)),
        scratch_shapes=[pltpu.VMEM((tm, tn), jnp.float32)],
        compiler_params=_cparams(("parallel", "parallel", "arbitrary")),
    )(x, w, b.reshape(1, N), resid)


def attention(q, k, v):
    # q, k, v: (B*H, T, dk) bf16 ; returns (B*H, T, dk) bf16.
    BH, T, dk = q.shape
    scale = 1.0 / math.sqrt(dk)
    kern = functools.partial(_attention_kernel, scale=scale)
    spec = pl.BlockSpec((1, T, dk), lambda b: (b, 0, 0))
    return pl.pallas_call(
        kern,
        out_shape=jax.ShapeDtypeStruct((BH, T, dk), jnp.bfloat16),
        grid=(BH,),
        in_specs=[spec, spec, spec],
        out_specs=pl.BlockSpec((1, T, dk), lambda b: (b, 0, 0)),
        compiler_params=_cparams(("parallel",)),
    )(q, k, v)


def layernorm(x, alpha, beta, eps=1e-6):
    M, D = x.shape
    tm = _tile(M, _TM)
    kern = functools.partial(_layernorm_kernel, eps=eps, d=D)
    return pl.pallas_call(
        kern,
        out_shape=jax.ShapeDtypeStruct((M, D), jnp.bfloat16),
        grid=(M // tm,),
        in_specs=[pl.BlockSpec((tm, D), lambda i: (i, 0)),
                  pl.BlockSpec((1, D), lambda i: (0, 0)),
                  pl.BlockSpec((1, D), lambda i: (0, 0))],
        out_specs=pl.BlockSpec((tm, D), lambda i: (i, 0)),
        compiler_params=_cparams(("parallel",)),
    )(x, alpha.reshape(1, D), beta.reshape(1, D))


def projection_lse(h, w, b):
    M, D = h.shape
    V = w.shape[1]
    tm = _tile(M, _TM_PROJ)
    tv = _tile(V, _TV)
    return pl.pallas_call(
        _proj_lse_kernel,
        out_shape=jax.ShapeDtypeStruct((M, 1), jnp.float32),
        grid=(M // tm, V // tv),
        in_specs=[pl.BlockSpec((tm, D), lambda i, j: (i, 0)),
                  pl.BlockSpec((D, tv), lambda i, j: (0, j)),
                  pl.BlockSpec((1, tv), lambda i, j: (0, j))],
        out_specs=pl.BlockSpec((tm, 1), lambda i, j: (i, 0)),
        scratch_shapes=[pltpu.VMEM((tm, 1), jnp.float32),
                        pltpu.VMEM((tm, 1), jnp.float32)],
        compiler_params=_cparams(("parallel", "arbitrary")),
    )(h, w, b.reshape(1, V))


def projection_logprobs(h, w, b, lse):
    M, D = h.shape
    V = w.shape[1]
    tm = _tile(M, _TM_PROJ)
    tv = _tile(V, _TV)
    return pl.pallas_call(
        _proj_sub_kernel,
        out_shape=jax.ShapeDtypeStruct((M, V), jnp.float32),
        grid=(M // tm, V // tv),
        in_specs=[pl.BlockSpec((tm, D), lambda i, j: (i, 0)),
                  pl.BlockSpec((D, tv), lambda i, j: (0, j)),
                  pl.BlockSpec((1, tv), lambda i, j: (0, j)),
                  pl.BlockSpec((tm, 1), lambda i, j: (i, 0))],
        out_specs=pl.BlockSpec((tm, tv), lambda i, j: (i, j)),
        compiler_params=_cparams(("parallel", "parallel")),
    )(h, w, b.reshape(1, V), lse)


# ----------------------------- Model glue -----------------------------------

def make_sinusoidal_pe(seq_len, d_model):
    position = jnp.arange(seq_len, dtype=jnp.float32)[:, None]
    div_term = jnp.exp(jnp.arange(0, d_model, 2, dtype=jnp.float32)
                       * (-math.log(10000.0) / d_model))
    pe = jnp.zeros((seq_len, d_model), dtype=jnp.float32)
    pe = pe.at[:, 0::2].set(jnp.sin(position * div_term))
    pe = pe.at[:, 1::2].set(jnp.cos(position * div_term))
    return pe


def init_params(key, vocab_size, seq_len, d_model, n_heads, n_layers, d_ff):
    # Matches GPT2Model._init_weights: Linear/Embedding weights ~ N(0, 0.02),
    # biases zero, LayerNorm alpha=1 bias=0.  Matmul weights are stored in bf16
    # (f32 accumulate in-kernel); Q/K/V are fused into one [D, 3D] matrix.
    del n_heads
    keys = jax.random.split(key, 2 + n_layers)

    def normal(k, shape, dtype=jnp.bfloat16):
        return (0.02 * jax.random.normal(k, shape, dtype=jnp.float32)).astype(dtype)

    zeros = lambda n: jnp.zeros((n,), jnp.float32)
    ones = lambda n: jnp.ones((n,), jnp.float32)

    params = {
        'tok_emb': normal(keys[0], (vocab_size, d_model), jnp.float32),
        'pe': make_sinusoidal_pe(seq_len, d_model),
        'lnf_a': ones(d_model), 'lnf_b': zeros(d_model),
        'wproj': normal(keys[1], (d_model, vocab_size)),
        'bproj': zeros(vocab_size),
        'layers': [],
    }
    for i in range(n_layers):
        lk = jax.random.split(keys[2 + i], 6)
        wq = normal(lk[0], (d_model, d_model))
        wk = normal(lk[1], (d_model, d_model))
        wv = normal(lk[2], (d_model, d_model))
        params['layers'].append(dict(
            wqkv=jnp.concatenate([wq, wk, wv], axis=1), bqkv=zeros(3 * d_model),
            wo=normal(lk[3], (d_model, d_model)), bo=zeros(d_model),
            w1=normal(lk[4], (d_model, d_ff)),    b1=zeros(d_ff),
            w2=normal(lk[5], (d_ff, d_model)),    b2=zeros(d_model),
            ln1_a=ones(d_model), ln1_b=zeros(d_model),
            ln2_a=ones(d_model), ln2_b=zeros(d_model),
        ))
    return params


def gpt2_forward(params, tokens, n_heads, mask=None):
    # forward is invoked with mask=None (no masking), matching the reference call.
    assert mask is None  # TODO(synk): causal/bool mask path not exercised by the reference forward.
    B, T = tokens.shape
    V, D = params['tok_emb'].shape
    H = n_heads
    dk = D // H
    M = B * T

    # InputEmbedding lookup (gather kept in plain JAX).
    # TODO(synk): embedding gather has no clean rectangular BlockSpec; done host-side.
    emb = jnp.take(params['tok_emb'], tokens, axis=0).astype(jnp.float32)   # [B,T,D]

    # x = emb*sqrt(D) + PE  (PE broadcast over batch via index_map; dropout identity)
    x = embed_add_pe(emb, params['pe'][:T], math.sqrt(D))                   # [B,T,D]
    x2 = x.reshape(M, D)                                                    # residual stream (f32)

    for lp in params['layers']:
        # --- self-attention sublayer: x + Wo(MHA(LN1(x))) ---
        qkv = ln_matmul(x2, lp['ln1_a'], lp['ln1_b'], lp['wqkv'], lp['bqkv'])   # [M, 3D] bf16
        qkv_h = qkv.reshape(B, T, 3, H, dk).transpose(2, 0, 3, 1, 4)            # [3,B,H,T,dk]
        qkv_h = qkv_h.reshape(3, B * H, T, dk)
        attn = attention(qkv_h[0], qkv_h[1], qkv_h[2])                          # [B*H,T,dk] bf16
        attn = attn.reshape(B, H, T, dk).transpose(0, 2, 1, 3).reshape(M, D)    # merge heads
        x2 = matmul_residual(attn, lp['wo'], lp['bo'], x2)                      # + residual (f32)

        # --- feed-forward sublayer: x + W2(relu(LN2(x) @ W1)) ---
        h1 = ln_matmul(x2, lp['ln2_a'], lp['ln2_b'], lp['w1'], lp['b1'],
                       relu=True)                                               # [M, F] bf16
        x2 = matmul_residual(h1, lp['w2'], lp['b2'], x2)                        # + residual (f32)

    # final LN (once) -> online LSE over vocab tiles -> log_softmax written in one pass
    h = layernorm(x2, params['lnf_a'], params['lnf_b'])                         # [M, D] bf16
    lse = projection_lse(h, params['wproj'], params['bproj'])                   # [M, 1]
    out = projection_logprobs(h, params['wproj'], params['bproj'], lse)         # [M, V] log-probs
    return out.reshape(B, T, V)


# ----------------------------- main ------------------------------------------

if __name__ == "__main__":
    vocab_size = 64
    seq_len = 8
    d_model = 32
    n_heads = 4
    n_layers = 2
    d_ff = 64
    B = 2

    key = jax.random.PRNGKey(0)
    k_params, k_tokens = jax.random.split(key)
    params = init_params(k_params, vocab_size, seq_len, d_model,
                         n_heads, n_layers, d_ff)
    tokens = jax.random.randint(k_tokens, (B, seq_len), 0, vocab_size,
                                dtype=jnp.int32)

    fwd = jax.jit(functools.partial(gpt2_forward, n_heads=n_heads))
    out = fwd(params, tokens)
    out = jax.block_until_ready(out)

    assert out.shape == (B, seq_len, vocab_size), out.shape
    assert bool(jnp.all(jnp.isfinite(out)))
    print("KERNEL_OK")
</pallas_src>

<mosaic_0001>
module attributes {stable_mosaic.version = 11 : i64} {
  func.func @_embed_pe_kernel(%arg0: i32, %arg1: i32, %arg2: memref<1x8x32xf32, #tpu.memory_space<vmem>>, %arg3: memref<8x32xf32, #tpu.memory_space<vmem>>, %arg4: memref<1x8x32xf32, #tpu.memory_space<vmem>>) attributes {dimension_semantics = [#tpu.dimension_semantics<parallel>, #tpu.dimension_semantics<parallel>], iteration_bounds = array<i64: 2, 1>, scalar_prefetch = 0 : i64, scratch_operands = 0 : i64, tpu.core_type = #tpu.core_type<tc>, window_params = [{transform_indices = @transform_0, window_bounds = array<i64: 1, 8, 32>}, {transform_indices = @transform_1, window_bounds = array<i64: 8, 32>}, {transform_indices = @transform_2, window_bounds = array<i64: 1, 8, 32>}]} {
    %c0 = arith.constant 0 : index
    %c0_0 = arith.constant 0 : index
    %c0_1 = arith.constant 0 : index
    %0 = vector.load %arg2[%c0, %c0_0, %c0_1] : memref<1x8x32xf32, #tpu.memory_space<vmem>>, vector<1x8x32xf32>
    %1 = vector.shape_cast %0 : vector<1x8x32xf32> to vector<8x32xf32>
    %cst = arith.constant 5.65685415 : f32
    %2 = vector.broadcast %cst : f32 to vector<8x32xf32>
    %3 = arith.mulf %1, %2 : vector<8x32xf32>
    %c0_2 = arith.constant 0 : index
    %c0_3 = arith.constant 0 : index
    %4 = vector.load %arg3[%c0_2, %c0_3] : memref<8x32xf32, #tpu.memory_space<vmem>>, vector<8x32xf32>
    %5 = arith.addf %3, %4 : vector<8x32xf32>
    %c0_4 = arith.constant 0 : index
    %c0_5 = arith.constant 0 : index
    %c0_6 = arith.constant 0 : index
    %6 = vector.load %arg4[%c0_4, %c0_5, %c0_6] : memref<1x8x32xf32, #tpu.memory_space<vmem>>, vector<1x8x32xf32>
    %7 = vector.shape_cast %6 : vector<1x8x32xf32> to vector<8x32xf32>
    %8 = vector.shape_cast %5 : vector<8x32xf32> to vector<1x8x32xf32>
    tpu.vector_store %arg4[%c0_4, %c0_5, %c0_6], %8 {strides = array<i32>} : memref<1x8x32xf32, #tpu.memory_space<vmem>>, vector<1x8x32xf32>,
    return
  }
  func.func @transform_0(%arg0: i32, %arg1: i32) -> (i32, i32, i32) {
    %c0_i32 = arith.constant 0 : i32
    %c0_i32_0 = arith.constant 0 : i32
    return %arg0, %arg1, %c0_i32 : i32, i32, i32
  }
  func.func @transform_1(%arg0: i32, %arg1: i32) -> (i32, i32) {
    %c0_i32 = arith.constant 0 : i32
    %c0_i32_0 = arith.constant 0 : i32
    return %arg1, %c0_i32 : i32, i32
  }
  func.func @transform_2(%arg0: i32, %arg1: i32) -> (i32, i32, i32) {
    %c0_i32 = arith.constant 0 : i32
    %c0_i32_0 = arith.constant 0 : i32
    return %arg0, %arg1, %c0_i32 : i32, i32, i32
  }
}

module attributes {stable_mosaic.version = 11 : i64} {
  func.func @_ln_matmul_kernel(%arg0: i32, %arg1: i32, %arg2: memref<16x32xf32, #tpu.memory_space<vmem>>, %arg3: memref<1x32xf32, #tpu.memory_space<vmem>>, %arg4: memref<1x32xf32, #tpu.memory_space<vmem>>, %arg5: memref<32x96xbf16, #tpu.memory_space<vmem>>, %arg6: memref<1x96xf32, #tpu.memory_space<vmem>>, %arg7: memref<16x96xbf16, #tpu.memory_space<vmem>>, %arg8: memref<16x32xbf16, #tpu.memory_space<vmem>>) attributes {dimension_semantics = [#tpu.dimension_semantics<parallel>, #tpu.dimension_semantics<arbitrary>], iteration_bounds = array<i64: 1, 1>, scalar_prefetch = 0 : i64, scratch_operands = 1 : i64, tpu.core_type = #tpu.core_type<tc>, window_params = [{transform_indices = @transform_0, window_bounds = array<i64: 16, 32>}, {pipeline_mode = #tpu.pipeline_mode<synchronous>, transform_indices = @transform_1, window_bounds = array<i64: 1, 32>}, {pipeline_mode = #tpu.pipeline_mode<synchronous>, transform_indices = @transform_2, window_bounds = array<i64: 1, 32>}, {transform_indices = @transform_3, window_bounds = array<i64: 32, 96>}, {transform_indices = @transform_4, window_bounds = array<i64: 1, 96>}, {transform_indices = @transform_5, window_bounds = array<i64: 16, 96>}]} {
    %c0_i32 = arith.constant 0 : i32
    %0 = arith.cmpi eq, %arg1, %c0_i32 : i32
    %1 = arith.extui %0 : i1 to i32
    %c0_i32_0 = arith.constant 0 : i32
    %2 = arith.cmpi ne, %1, %c0_i32_0 : i32
    scf.if %2 {
      %c0_8 = arith.constant 0 : index
      %c0_9 = arith.constant 0 : index
      %11 = vector.load %arg2[%c0_8, %c0_9] : memref<16x32xf32, #tpu.memory_space<vmem>>, vector<16x32xf32>
      %c0_10 = arith.constant 0 : index
      %c0_11 = arith.constant 0 : index
      %12 = vector.load %arg3[%c0_10, %c0_11] : memref<1x32xf32, #tpu.memory_space<vmem>>, vector<1x32xf32>
      %c0_12 = arith.constant 0 : index
      %c0_13 = arith.constant 0 : index
      %13 = vector.load %arg4[%c0_12, %c0_13] : memref<1x32xf32, #tpu.memory_space<vmem>>, vector<1x32xf32>
      %cst_14 = arith.constant dense<0.000000e+00> : vector<16xf32>
      %14 = vector.multi_reduction <add>, %11, %cst_14 [1] : vector<16x32xf32> to vector<16xf32>
      %15 = vector.shape_cast %14 : vector<16xf32> to vector<16x1xf32>
      %cst_15 = arith.constant 3.200000e+01 : f32
      %16 = vector.broadcast %cst_15 : f32 to vector<16x1xf32>
      %17 = arith.divf %15, %16 : vector<16x1xf32>
      %18 = vector.broadcast %17 : vector<16x1xf32> to vector<16x32xf32>
      %19 = arith.subf %11, %18 : vector<16x32xf32>
      %20 = arith.mulf %19, %19 : vector<16x32xf32>
      %cst_16 = arith.constant dense<0.000000e+00> : vector<16xf32>
      %21 = vector.multi_reduction <add>, %20, %cst_16 [1] : vector<16x32xf32> to vector<16xf32>
      %22 = vector.shape_cast %21 : vector<16xf32> to vector<16x1xf32>
      %cst_17 = arith.constant 0.0322580636 : f32
      %23 = vector.broadcast %cst_17 : f32 to vector<16x1xf32>
      %24 = arith.mulf %22, %23 : vector<16x1xf32>
      %25 = vector.broadcast %12 : vector<1x32xf32> to vector<16x32xf32>
      %26 = arith.mulf %25, %19 : vector<16x32xf32>
      %27 = math.sqrt %24 : vector<16x1xf32>
      %cst_18 = arith.constant 9.99999997E-7 : f32
      %28 = vector.broadcast %cst_18 : f32 to vector<16x1xf32>
      %29 = arith.addf %27, %28 : vector<16x1xf32>
      %30 = vector.broadcast %29 : vector<16x1xf32> to vector<16x32xf32>
      %31 = arith.divf %26, %30 : vector<16x32xf32>
      %32 = vector.broadcast %13 : vector<1x32xf32> to vector<16x32xf32>
      %33 = arith.addf %31, %32 : vector<16x32xf32>
      %34 = arith.truncf %33 : vector<16x32xf32> to vector<16x32xbf16>
      %c0_19 = arith.constant 0 : index
      %c0_20 = arith.constant 0 : index
      %35 = vector.load %arg8[%c0_19, %c0_20] : memref<16x32xbf16, #tpu.memory_space<vmem>>, vector<16x32xbf16>
      tpu.vector_store %arg8[%c0_19, %c0_20], %34 {strides = array<i32>} : memref<16x32xbf16, #tpu.memory_space<vmem>>, vector<16x32xbf16>,
    } else {
    }
    %c0 = arith.constant 0 : index
    %c0_1 = arith.constant 0 : index
    %3 = vector.load %arg8[%c0, %c0_1] : memref<16x32xbf16, #tpu.memory_space<vmem>>, vector<16x32xbf16>
    %c0_2 = arith.constant 0 : index
    %c0_3 = arith.constant 0 : index
    %4 = vector.load %arg5[%c0_2, %c0_3] : memref<32x96xbf16, #tpu.memory_space<vmem>>, vector<32x96xbf16>
    %cst = arith.constant dense<0.000000e+00> : vector<16x96xf32>
    %5 = tpu.matmul %3, %4, %cst {dimension_numbers = #tpu.dot_dimension_numbers<[1], [0], [0], [1], [0, 0, 1, 1], [], []>} : vector<16x32xbf16>, vector<32x96xbf16>, vector<16x96xf32> -> vector<16x96xf32>
    %c0_4 = arith.constant 0 : index
    %c0_5 = arith.constant 0 : index
    %6 = vector.load %arg6[%c0_4, %c0_5] : memref<1x96xf32, #tpu.memory_space<vmem>>, vector<1x96xf32>
    %7 = vector.broadcast %6 : vector<1x96xf32> to vector<16x96xf32>
    %8 = arith.addf %5, %7 : vector<16x96xf32>
    %9 = arith.truncf %8 : vector<16x96xf32> to vector<16x96xbf16>
    %c0_6 = arith.constant 0 : index
    %c0_7 = arith.constant 0 : index
    %10 = vector.load %arg7[%c0_6, %c0_7] : memref<16x96xbf16, #tpu.memory_space<vmem>>, vector<16x96xbf16>
    tpu.vector_store %arg7[%c0_6, %c0_7], %9 {strides = array<i32>} : memref<16x96xbf16, #tpu.memory_space<vmem>>, vector<16x96xbf16>,
    return
  }
  func.func @transform_0(%arg0: i32, %arg1: i32) -> (i32, i32) {
    %c0_i32 = arith.constant 0 : i32
    %c0_i32_0 = arith.constant 0 : i32
    return %arg0, %c0_i32 : i32, i32
  }
  func.func @transform_1(%arg0: i32, %arg1: i32) -> (i32, i32) {
    %c0_i32 = arith.constant 0 : i32
    %c0_i32_0 = arith.constant 0 : i32
    %c0_i32_1 = arith.constant 0 : i32
    return %c0_i32, %c0_i32_0 : i32, i32
  }
  func.func @transform_2(%arg0: i32, %arg1: i32) -> (i32, i32) {
    %c0_i32 = arith.constant 0 : i32
    %c0_i32_0 = arith.constant 0 : i32
    %c0_i32_1 = arith.constant 0 : i32
    return %c0_i32, %c0_i32_0 : i32, i32
  }
  func.func @transform_3(%arg0: i32, %arg1: i32) -> (i32, i32) {
    %c0_i32 = arith.constant 0 : i32
    %c0_i32_0 = arith.constant 0 : i32
    return %c0_i32, %arg1 : i32, i32
  }
  func.func @transform_4(%arg0: i32, %arg1: i32) -> (i32, i32) {
    %c0_i32 = arith.constant 0 : i32
    %c0_i32_0 = arith.constant 0 : i32
    return %c0_i32, %arg1 : i32, i32
  }
  func.func @transform_5(%arg0: i32, %arg1: i32) -> (i32, i32) {
    %c0_i32 = arith.constant 0 : i32
    return %arg0, %arg1 : i32, i32
  }
}

module attributes {stable_mosaic.version = 11 : i64} {
  func.func @_attention_kernel(%arg0: i32, %arg1: memref<1x8x8xbf16, #tpu.memory_space<vmem>>, %arg2: memref<1x8x8xbf16, #tpu.memory_space<vmem>>, %arg3: memref<1x8x8xbf16, #tpu.memory_space<vmem>>, %arg4: memref<1x8x8xbf16, #tpu.memory_space<vmem>>) attributes {dimension_semantics = [#tpu.dimension_semantics<parallel>], iteration_bounds = array<i64: 8>, scalar_prefetch = 0 : i64, scratch_operands = 0 : i64, tpu.core_type = #tpu.core_type<tc>, window_params = [{transform_indices = @transform_0, window_bounds = array<i64: 1, 8, 8>}, {transform_indices = @transform_1, window_bounds = array<i64: 1, 8, 8>}, {transform_indices = @transform_2, window_bounds = array<i64: 1, 8, 8>}, {transform_indices = @transform_3, window_bounds = array<i64: 1, 8, 8>}]} {
    %c0 = arith.constant 0 : index
    %c0_0 = arith.constant 0 : index
    %c0_1 = arith.constant 0 : index
    %0 = vector.load %arg1[%c0, %c0_0, %c0_1] : memref<1x8x8xbf16, #tpu.memory_space<vmem>>, vector<1x8x8xbf16>
    %1 = vector.shape_cast %0 : vector<1x8x8xbf16> to vector<8x8xbf16>
    %cst = arith.constant 3.535160e-01 : bf16
    %2 = vector.broadcast %cst : bf16 to vector<8x8xbf16>
    %3 = arith.mulf %1, %2 : vector<8x8xbf16>
    %c0_2 = arith.constant 0 : index
    %c0_3 = arith.constant 0 : index
    %c0_4 = arith.constant 0 : index
    %4 = vector.load %arg2[%c0_2, %c0_3, %c0_4] : memref<1x8x8xbf16, #tpu.memory_space<vmem>>, vector<1x8x8xbf16>
    %5 = vector.shape_cast %4 : vector<1x8x8xbf16> to vector<8x8xbf16>
    %c0_5 = arith.constant 0 : index
    %c0_6 = arith.constant 0 : index
    %c0_7 = arith.constant 0 : index
    %6 = vector.load %arg3[%c0_5, %c0_6, %c0_7] : memref<1x8x8xbf16, #tpu.memory_space<vmem>>, vector<1x8x8xbf16>
    %7 = vector.shape_cast %6 : vector<1x8x8xbf16> to vector<8x8xbf16>
    %cst_8 = arith.constant dense<0.000000e+00> : vector<8x8xf32>
    %8 = tpu.matmul %3, %5, %cst_8 {dimension_numbers = #tpu.dot_dimension_numbers<[1], [1], [0], [0], [0, 0, 1, 0], [], []>} : vector<8x8xbf16>, vector<8x8xbf16>, vector<8x8xf32> -> vector<8x8xf32>
    %cst_9 = arith.constant dense<0xFF800000> : vector<8xf32>
    %9 = vector.multi_reduction <maximumf>, %8, %cst_9 [1] : vector<8x8xf32> to vector<8xf32>
    %10 = vector.shape_cast %9 : vector<8xf32> to vector<8x1xf32>
    %11 = vector.broadcast %10 : vector<8x1xf32> to vector<8x8xf32>
    %12 = arith.subf %8, %11 : vector<8x8xf32>
    %13 = math.exp %12 : vector<8x8xf32>
    %cst_10 = arith.constant dense<0.000000e+00> : vector<8xf32>
    %14 = vector.multi_reduction <add>, %13, %cst_10 [1] : vector<8x8xf32> to vector<8xf32>
    %15 = vector.shape_cast %14 : vector<8xf32> to vector<8x1xf32>
    %16 = tpu.reciprocal %15 {approx = true} : vector<8x1xf32> -> vector<8x1xf32>
    %17 = vector.broadcast %16 : vector<8x1xf32> to vector<8x8xf32>
    %18 = arith.mulf %13, %17 : vector<8x8xf32>
    %19 = arith.truncf %18 : vector<8x8xf32> to vector<8x8xbf16>
    %cst_11 = arith.constant dense<0.000000e+00> : vector<8x8xf32>
    %20 = tpu.matmul %19, %7, %cst_11 {dimension_numbers = #tpu.dot_dimension_numbers<[1], [0], [0], [1], [0, 0, 1, 1], [], []>} : vector<8x8xbf16>, vector<8x8xbf16>, vector<8x8xf32> -> vector<8x8xf32>
    %21 = arith.truncf %20 : vector<8x8xf32> to vector<8x8xbf16>
    %c0_12 = arith.constant 0 : index
    %c0_13 = arith.constant 0 : index
    %c0_14 = arith.constant 0 : index
    %22 = vector.load %arg4[%c0_12, %c0_13, %c0_14] : memref<1x8x8xbf16, #tpu.memory_space<vmem>>, vector<1x8x8xbf16>
    %23 = vector.shape_cast %22 : vector<1x8x8xbf16> to vector<8x8xbf16>
    %24 = vector.shape_cast %21 : vector<8x8xbf16> to vector<1x8x8xbf16>
    tpu.vector_store %arg4[%c0_12, %c0_13, %c0_14], %24 {strides = array<i32>} : memref<1x8x8xbf16, #tpu.memory_space<vmem>>, vector<1x8x8xbf16>,
    return
  }
  func.func @transform_0(%arg0: i32) -> (i32, i32, i32) {
    %c0_i32 = arith.constant 0 : i32
    %c0_i32_0 = arith.constant 0 : i32
    %c0_i32_1 = arith.constant 0 : i32
    return %arg0, %c0_i32, %c0_i32_0 : i32, i32, i32
  }
  func.func @transform_1(%arg0: i32) -> (i32, i32, i32) {
    %c0_i32 = arith.constant 0 : i32
    %c0_i32_0 = arith.constant 0 : i32
    %c0_i32_1 = arith.constant 0 : i32
    return %arg0, %c0_i32, %c0_i32_0 : i32, i32, i32
  }
  func.func @transform_2(%arg0: i32) -> (i32, i32, i32) {
    %c0_i32 = arith.constant 0 : i32
    %c0_i32_0 = arith.constant 0 : i32
    %c0_i32_1 = arith.constant 0 : i32
    return %arg0, %c0_i32, %c0_i32_0 : i32, i32, i32
  }
  func.func @transform_3(%arg0: i32) -> (i32, i32, i32) {
    %c0_i32 = arith.constant 0 : i32
    %c0_i32_0 = arith.constant 0 : i32
    %c0_i32_1 = arith.constant 0 : i32
    return %arg0, %c0_i32, %c0_i32_0 : i32, i32, i32
  }
}

module attributes {stable_mosaic.version = 11 : i64} {
  func.func @_ln_matmul_kernel(%arg0: i32, %arg1: i32, %arg2: memref<16x32xf32, #tpu.memory_space<vmem>>, %arg3: memref<1x32xf32, #tpu.memory_space<vmem>>, %arg4: memref<1x32xf32, #tpu.memory_space<vmem>>, %arg5: memref<32x64xbf16, #tpu.memory_space<vmem>>, %arg6: memref<1x64xf32, #tpu.memory_space<vmem>>, %arg7: memref<16x64xbf16, #tpu.memory_space<vmem>>, %arg8: memref<16x32xbf16, #tpu.memory_space<vmem>>) attributes {dimension_semantics = [#tpu.dimension_semantics<parallel>, #tpu.dimension_semantics<arbitrary>], iteration_bounds = array<i64: 1, 1>, scalar_prefetch = 0 : i64, scratch_operands = 1 : i64, tpu.core_type = #tpu.core_type<tc>, window_params = [{transform_indices = @transform_0, window_bounds = array<i64: 16, 32>}, {pipeline_mode = #tpu.pipeline_mode<synchronous>, transform_indices = @transform_1, window_bounds = array<i64: 1, 32>}, {pipeline_mode = #tpu.pipeline_mode<synchronous>, transform_indices = @transform_2, window_bounds = array<i64: 1, 32>}, {transform_indices = @transform_3, window_bounds = array<i64: 32, 64>}, {transform_indices = @transform_4, window_bounds = array<i64: 1, 64>}, {transform_indices = @transform_5, window_bounds = array<i64: 16, 64>}]} {
    %c0_i32 = arith.constant 0 : i32
    %0 = arith.cmpi eq, %arg1, %c0_i32 : i32
    %1 = arith.extui %0 : i1 to i32
    %c0_i32_0 = arith.constant 0 : i32
    %2 = arith.cmpi ne, %1, %c0_i32_0 : i32
    scf.if %2 {
      %c0_9 = arith.constant 0 : index
      %c0_10 = arith.constant 0 : index
      %13 = vector.load %arg2[%c0_9, %c0_10] : memref<16x32xf32, #tpu.memory_space<vmem>>, vector<16x32xf32>
      %c0_11 = arith.constant 0 : index
      %c0_12 = arith.constant 0 : index
      %14 = vector.load %arg3[%c0_11, %c0_12] : memref<1x32xf32, #tpu.memory_space<vmem>>, vector<1x32xf32>
      %c0_13 = arith.constant 0 : index
      %c0_14 = arith.constant 0 : index
      %15 = vector.load %arg4[%c0_13, %c0_14] : memref<1x32xf32, #tpu.memory_space<vmem>>, vector<1x32xf32>
      %cst_15 = arith.constant dense<0.000000e+00> : vector<16xf32>
      %16 = vector.multi_reduction <add>, %13, %cst_15 [1] : vector<16x32xf32> to vector<16xf32>
      %17 = vector.shape_cast %16 : vector<16xf32> to vector<16x1xf32>
      %cst_16 = arith.constant 3.200000e+01 : f32
      %18 = vector.broadcast %cst_16 : f32 to vector<16x1xf32>
      %19 = arith.divf %17, %18 : vector<16x1xf32>
      %20 = vector.broadcast %19 : vector<16x1xf32> to vector<16x32xf32>
      %21 = arith.subf %13, %20 : vector<16x32xf32>
      %22 = arith.mulf %21, %21 : vector<16x32xf32>
      %cst_17 = arith.constant dense<0.000000e+00> : vector<16xf32>
      %23 = vector.multi_reduction <add>, %22, %cst_17 [1] : vector<16x32xf32> to vector<16xf32>
      %24 = vector.shape_cast %23 : vector<16xf32> to vector<16x1xf32>
      %cst_18 = arith.constant 0.0322580636 : f32
      %25 = vector.broadcast %cst_18 : f32 to vector<16x1xf32>
      %26 = arith.mulf %24, %25 : vector<16x1xf32>
      %27 = vector.broadcast %14 : vector<1x32xf32> to vector<16x32xf32>
      %28 = arith.mulf %27, %21 : vector<16x32xf32>
      %29 = math.sqrt %26 : vector<16x1xf32>
      %cst_19 = arith.constant 9.99999997E-7 : f32
      %30 = vector.broadcast %cst_19 : f32 to vector<16x1xf32>
      %31 = arith.addf %29, %30 : vector<16x1xf32>
      %32 = vector.broadcast %31 : vector<16x1xf32> to vector<16x32xf32>
      %33 = arith.divf %28, %32 : vector<16x32xf32>
      %34 = vector.broadcast %15 : vector<1x32xf32> to vector<16x32xf32>
      %35 = arith.addf %33, %34 : vector<16x32xf32>
      %36 = arith.truncf %35 : vector<16x32xf32> to vector<16x32xbf16>
      %c0_20 = arith.constant 0 : index
      %c0_21 = arith.constant 0 : index
      %37 = vector.load %arg8[%c0_20, %c0_21] : memref<16x32xbf16, #tpu.memory_space<vmem>>, vector<16x32xbf16>
      tpu.vector_store %arg8[%c0_20, %c0_21], %36 {strides = array<i32>} : memref<16x32xbf16, #tpu.memory_space<vmem>>, vector<16x32xbf16>,
    } else {
    }
    %c0 = arith.constant 0 : index
    %c0_1 = arith.constant 0 : index
    %3 = vector.load %arg8[%c0, %c0_1] : memref<16x32xbf16, #tpu.memory_space<vmem>>, vector<16x32xbf16>
    %c0_2 = arith.constant 0 : index
    %c0_3 = arith.constant 0 : index
    %4 = vector.load %arg5[%c0_2, %c0_3] : memref<32x64xbf16, #tpu.memory_space<vmem>>, vector<32x64xbf16>
    %cst = arith.constant dense<0.000000e+00> : vector<16x64xf32>
    %5 = tpu.matmul %3, %4, %cst {dimension_numbers = #tpu.dot_dimension_numbers<[1], [0], [0], [1], [0, 0, 1, 1], [], []>} : vector<16x32xbf16>, vector<32x64xbf16>, vector<16x64xf32> -> vector<16x64xf32>
    %c0_4 = arith.constant 0 : index
    %c0_5 = arith.constant 0 : index
    %6 = vector.load %arg6[%c0_4, %c0_5] : memref<1x64xf32, #tpu.memory_space<vmem>>, vector<1x64xf32>
    %7 = vector.broadcast %6 : vector<1x64xf32> to vector<16x64xf32>
    %8 = arith.addf %5, %7 : vector<16x64xf32>
    %cst_6 = arith.constant 0.000000e+00 : f32
    %9 = vector.broadcast %cst_6 : f32 to vector<16x64xf32>
    %10 = arith.maximumf %8, %9 : vector<16x64xf32>
    %11 = arith.truncf %10 : vector<16x64xf32> to vector<16x64xbf16>
    %c0_7 = arith.constant 0 : index
    %c0_8 = arith.constant 0 : index
    %12 = vector.load %arg7[%c0_7, %c0_8] : memref<16x64xbf16, #tpu.memory_space<vmem>>, vector<16x64xbf16>
    tpu.vector_store %arg7[%c0_7, %c0_8], %11 {strides = array<i32>} : memref<16x64xbf16, #tpu.memory_space<vmem>>, vector<16x64xbf16>,
    return
  }
  func.func @transform_0(%arg0: i32, %arg1: i32) -> (i32, i32) {
    %c0_i32 = arith.constant 0 : i32
    %c0_i32_0 = arith.constant 0 : i32
    return %arg0, %c0_i32 : i32, i32
  }
  func.func @transform_1(%arg0: i32, %arg1: i32) -> (i32, i32) {
    %c0_i32 = arith.constant 0 : i32
    %c0_i32_0 = arith.constant 0 : i32
    %c0_i32_1 = arith.constant 0 : i32
    return %c0_i32, %c0_i32_0 : i32, i32
  }
  func.func @transform_2(%arg0: i32, %arg1: i32) -> (i32, i32) {
    %c0_i32 = arith.constant 0 : i32
    %c0_i32_0 = arith.constant 0 : i32
    %c0_i32_1 = arith.constant 0 : i32
    return %c0_i32, %c0_i32_0 : i32, i32
  }
  func.func @transform_3(%arg0: i32, %arg1: i32) -> (i32, i32) {
    %c0_i32 = arith.constant 0 : i32
    %c0_i32_0 = arith.constant 0 : i32
    return %c0_i32, %arg1 : i32, i32
  }
  func.func @transform_4(%arg0: i32, %arg1: i32) -> (i32, i32) {
    %c0_i32 = arith.constant 0 : i32
    %c0_i32_0 = arith.constant 0 : i32
    return %c0_i32, %arg1 : i32, i32
  }
  func.func @transform_5(%arg0: i32, %arg1: i32) -> (i32, i32) {
    %c0_i32 = arith.constant 0 : i32
    return %arg0, %arg1 : i32, i32
  }
}

module attributes {stable_mosaic.version = 11 : i64} {
  func.func @_matmul_resid_kernel(%arg0: i32, %arg1: i32, %arg2: i32, %arg3: memref<16x32xbf16, #tpu.memory_space<vmem>>, %arg4: memref<32x32xbf16, #tpu.memory_space<vmem>>, %arg5: memref<1x32xf32, #tpu.memory_space<vmem>>, %arg6: memref<16x32xf32, #tpu.memory_space<vmem>>, %arg7: memref<16x32xf32, #tpu.memory_space<vmem>>, %arg8: memref<16x32xf32, #tpu.memory_space<vmem>>) attributes {dimension_semantics = [#tpu.dimension_semantics<parallel>, #tpu.dimension_semantics<parallel>, #tpu.dimension_semantics<arbitrary>], iteration_bounds = array<i64: 1, 1, 1>, scalar_prefetch = 0 : i64, scratch_operands = 1 : i64, tpu.core_type = #tpu.core_type<tc>, window_params = [{transform_indices = @transform_0, window_bounds = array<i64: 16, 32>}, {transform_indices = @transform_1, window_bounds = array<i64: 32, 32>}, {transform_indices = @transform_2, window_bounds = array<i64: 1, 32>}, {transform_indices = @transform_3, window_bounds = array<i64: 16, 32>}, {transform_indices = @transform_4, window_bounds = array<i64: 16, 32>}]} {
    %c0_i32 = arith.constant 0 : i32
    %0 = arith.cmpi eq, %arg2, %c0_i32 : i32
    %1 = arith.extui %0 : i1 to i32
    %c0_i32_0 = arith.constant 0 : i32
    %2 = arith.cmpi ne, %1, %c0_i32_0 : i32
    scf.if %2 {
      %cst_10 = arith.constant 0.000000e+00 : f32
      %12 = vector.broadcast %cst_10 : f32 to vector<16x32xf32>
      %c0_11 = arith.constant 0 : index
      %c0_12 = arith.constant 0 : index
      %13 = vector.load %arg8[%c0_11, %c0_12] : memref<16x32xf32, #tpu.memory_space<vmem>>, vector<16x32xf32>
      tpu.vector_store %arg8[%c0_11, %c0_12], %12 {strides = array<i32>} : memref<16x32xf32, #tpu.memory_space<vmem>>, vector<16x32xf32>,
    } else {
    }
    %c0 = arith.constant 0 : index
    %c0_1 = arith.constant 0 : index
    %3 = vector.load %arg8[%c0, %c0_1] : memref<16x32xf32, #tpu.memory_space<vmem>>, vector<16x32xf32>
    %c0_2 = arith.constant 0 : index
    %c0_3 = arith.constant 0 : index
    %4 = vector.load %arg3[%c0_2, %c0_3] : memref<16x32xbf16, #tpu.memory_space<vmem>>, vector<16x32xbf16>
    %c0_4 = arith.constant 0 : index
    %c0_5 = arith.constant 0 : index
    %5 = vector.load %arg4[%c0_4, %c0_5] : memref<32x32xbf16, #tpu.memory_space<vmem>>, vector<32x32xbf16>
    %cst = arith.constant dense<0.000000e+00> : vector<16x32xf32>
    %6 = tpu.matmul %4, %5, %cst {dimension_numbers = #tpu.dot_dimension_numbers<[1], [0], [0], [1], [0, 0, 1, 1], [], []>} : vector<16x32xbf16>, vector<32x32xbf16>, vector<16x32xf32> -> vector<16x32xf32>
    %7 = arith.addf %3, %6 : vector<16x32xf32>
    %c0_6 = arith.constant 0 : index
    %c0_7 = arith.constant 0 : index
    %8 = vector.load %arg8[%c0_6, %c0_7] : memref<16x32xf32, #tpu.memory_space<vmem>>, vector<16x32xf32>
    tpu.vector_store %arg8[%c0_6, %c0_7], %7 {strides = array<i32>} : memref<16x32xf32, #tpu.memory_space<vmem>>, vector<16x32xf32>,
    %c0_i32_8 = arith.constant 0 : i32
    %9 = arith.cmpi eq, %arg2, %c0_i32_8 : i32
    %10 = arith.extui %9 : i1 to i32
    %c0_i32_9 = arith.constant 0 : i32
    %11 = arith.cmpi ne, %10, %c0_i32_9 : i32
    scf.if %11 {
      %c0_10 = arith.constant 0 : index
      %c0_11 = arith.constant 0 : index
      %12 = vector.load %arg8[%c0_10, %c0_11] : memref<16x32xf32, #tpu.memory_space<vmem>>, vector<16x32xf32>
      %c0_12 = arith.constant 0 : index
      %c0_13 = arith.constant 0 : index
      %13 = vector.load %arg5[%c0_12, %c0_13] : memref<1x32xf32, #tpu.memory_space<vmem>>, vector<1x32xf32>
      %14 = vector.broadcast %13 : vector<1x32xf32> to vector<16x32xf32>
      %15 = arith.addf %12, %14 : vector<16x32xf32>
      %c0_14 = arith.constant 0 : index
      %c0_15 = arith.constant 0 : index
      %16 = vector.load %arg6[%c0_14, %c0_15] : memref<16x32xf32, #tpu.memory_space<vmem>>, vector<16x32xf32>
      %17 = arith.addf %15, %16 : vector<16x32xf32>
      %c0_16 = arith.constant 0 : index
      %c0_17 = arith.constant 0 : index
      %18 = vector.load %arg7[%c0_16, %c0_17] : memref<16x32xf32, #tpu.memory_space<vmem>>, vector<16x32xf32>
      tpu.vector_store %arg7[%c0_16, %c0_17], %17 {strides = array<i32>} : memref<16x32xf32, #tpu.memory_space<vmem>>, vector<16x32xf32>,
    } else {
    }
    return
  }
  func.func @transform_0(%arg0: i32, %arg1: i32, %arg2: i32) -> (i32, i32) {
    %c0_i32 = arith.constant 0 : i32
    return %arg0, %arg2 : i32, i32
  }
  func.func @transform_1(%arg0: i32, %arg1: i32, %arg2: i32) -> (i32, i32) {
    %c0_i32 = arith.constant 0 : i32
    return %arg2, %arg1 : i32, i32
  }
  func.func @transform_2(%arg0: i32, %arg1: i32, %arg2: i32) -> (i32, i32) {
    %c0_i32 = arith.constant 0 : i32
    %c0_i32_0 = arith.constant 0 : i32
    return %c0_i32, %arg1 : i32, i32
  }
  func.func @transform_3(%arg0: i32, %arg1: i32, %arg2: i32) -> (i32, i32) {
    %c0_i32 = arith.constant 0 : i32
    return %arg0, %arg1 : i32, i32
  }
  func.func @transform_4(%arg0: i32, %arg1: i32, %arg2: i32) -> (i32, i32) {
    %c0_i32 = arith.constant 0 : i32
    return %arg0, %arg1 : i32, i32
  }
}

module attributes {stable_mosaic.version = 11 : i64} {
  func.func @_matmul_resid_kernel(%arg0: i32, %arg1: i32, %arg2: i32, %arg3: memref<16x64xbf16, #tpu.memory_space<vmem>>, %arg4: memref<64x32xbf16, #tpu.memory_space<vmem>>, %arg5: memref<1x32xf32, #tpu.memory_space<vmem>>, %arg6: memref<16x32xf32, #tpu.memory_space<vmem>>, %arg7: memref<16x32xf32, #tpu.memory_space<vmem>>, %arg8: memref<16x32xf32, #tpu.memory_space<vmem>>) attributes {dimension_semantics = [#tpu.dimension_semantics<parallel>, #tpu.dimension_semantics<parallel>, #tpu.dimension_semantics<arbitrary>], iteration_bounds = array<i64: 1, 1, 1>, scalar_prefetch = 0 : i64, scratch_operands = 1 : i64, tpu.core_type = #tpu.core_type<tc>, window_params = [{transform_indices = @transform_0, window_bounds = array<i64: 16, 64>}, {transform_indices = @transform_1, window_bounds = array<i64: 64, 32>}, {transform_indices = @transform_2, window_bounds = array<i64: 1, 32>}, {transform_indices = @transform_3, window_bounds = array<i64: 16, 32>}, {transform_indices = @transform_4, window_bounds = array<i64: 16, 32>}]} {
    %c0_i32 = arith.constant 0 : i32
    %0 = arith.cmpi eq, %arg2, %c0_i32 : i32
    %1 = arith.extui %0 : i1 to i32
    %c0_i32_0 = arith.constant 0 : i32
    %2 = arith.cmpi ne, %1, %c0_i32_0 : i32
    scf.if %2 {
      %cst_10 = arith.constant 0.000000e+00 : f32
      %12 = vector.broadcast %cst_10 : f32 to vector<16x32xf32>
      %c0_11 = arith.constant 0 : index
      %c0_12 = arith.constant 0 : index
      %13 = vector.load %arg8[%c0_11, %c0_12] : memref<16x32xf32, #tpu.memory_space<vmem>>, vector<16x32xf32>
      tpu.vector_store %arg8[%c0_11, %c0_12], %12 {strides = array<i32>} : memref<16x32xf32, #tpu.memory_space<vmem>>, vector<16x32xf32>,
    } else {
    }
    %c0 = arith.constant 0 : index
    %c0_1 = arith.constant 0 : index
    %3 = vector.load %arg8[%c0, %c0_1] : memref<16x32xf32, #tpu.memory_space<vmem>>, vector<16x32xf32>
    %c0_2 = arith.constant 0 : index
    %c0_3 = arith.constant 0 : index
    %4 = vector.load %arg3[%c0_2, %c0_3] : memref<16x64xbf16, #tpu.memory_space<vmem>>, vector<16x64xbf16>
    %c0_4 = arith.constant 0 : index
    %c0_5 = arith.constant 0 : index
    %5 = vector.load %arg4[%c0_4, %c0_5] : memref<64x32xbf16, #tpu.memory_space<vmem>>, vector<64x32xbf16>
    %cst = arith.constant dense<0.000000e+00> : vector<16x32xf32>
    %6 = tpu.matmul %4, %5, %cst {dimension_numbers = #tpu.dot_dimension_numbers<[1], [0], [0], [1], [0, 0, 1, 1], [], []>} : vector<16x64xbf16>, vector<64x32xbf16>, vector<16x32xf32> -> vector<16x32xf32>
    %7 = arith.addf %3, %6 : vector<16x32xf32>
    %c0_6 = arith.constant 0 : index
    %c0_7 = arith.constant 0 : index
    %8 = vector.load %arg8[%c0_6, %c0_7] : memref<16x32xf32, #tpu.memory_space<vmem>>, vector<16x32xf32>
    tpu.vector_store %arg8[%c0_6, %c0_7], %7 {strides = array<i32>} : memref<16x32xf32, #tpu.memory_space<vmem>>, vector<16x32xf32>,
    %c0_i32_8 = arith.constant 0 : i32
    %9 = arith.cmpi eq, %arg2, %c0_i32_8 : i32
    %10 = arith.extui %9 : i1 to i32
    %c0_i32_9 = arith.constant 0 : i32
    %11 = arith.cmpi ne, %10, %c0_i32_9 : i32
    scf.if %11 {
      %c0_10 = arith.constant 0 : index
      %c0_11 = arith.constant 0 : index
      %12 = vector.load %arg8[%c0_10, %c0_11] : memref<16x32xf32, #tpu.memory_space<vmem>>, vector<16x32xf32>
      %c0_12 = arith.constant 0 : index
      %c0_13 = arith.constant 0 : index
      %13 = vector.load %arg5[%c0_12, %c0_13] : memref<1x32xf32, #tpu.memory_space<vmem>>, vector<1x32xf32>
      %14 = vector.broadcast %13 : vector<1x32xf32> to vector<16x32xf32>
      %15 = arith.addf %12, %14 : vector<16x32xf32>
      %c0_14 = arith.constant 0 : index
      %c0_15 = arith.constant 0 : index
      %16 = vector.load %arg6[%c0_14, %c0_15] : memref<16x32xf32, #tpu.memory_space<vmem>>, vector<16x32xf32>
      %17 = arith.addf %15, %16 : vector<16x32xf32>
      %c0_16 = arith.constant 0 : index
      %c0_17 = arith.constant 0 : index
      %18 = vector.load %arg7[%c0_16, %c0_17] : memref<16x32xf32, #tpu.memory_space<vmem>>, vector<16x32xf32>
      tpu.vector_store %arg7[%c0_16, %c0_17], %17 {strides = array<i32>} : memref<16x32xf32, #tpu.memory_space<vmem>>, vector<16x32xf32>,
    } else {
    }
    return
  }
  func.func @transform_0(%arg0: i32, %arg1: i32, %arg2: i32) -> (i32, i32) {
    %c0_i32 = arith.constant 0 : i32
    return %arg0, %arg2 : i32, i32
  }
  func.func @transform_1(%arg0: i32, %arg1: i32, %arg2: i32) -> (i32, i32) {
    %c0_i32 = arith.constant 0 : i32
    return %arg2, %arg1 : i32, i32
  }
  func.func @transform_2(%arg0: i32, %arg1: i32, %arg2: i32) -> (i32, i32) {
    %c0_i32 = arith.constant 0 : i32
    %c0_i32_0 = arith.constant 0 : i32
    return %c0_i32, %arg1 : i32, i32
  }
  func.func @transform_3(%arg0: i32, %arg1: i32, %arg2: i32) -> (i32, i32) {
    %c0_i32 = arith.constant 0 : i32
    return %arg0, %arg1 : i32, i32
  }
  func.func @transform_4(%arg0: i32, %arg1: i32, %arg2: i32) -> (i32, i32) {
    %c0_i32 = arith.constant 0 : i32
    return %arg0, %arg1 : i32, i32
  }
}

module attributes {stable_mosaic.version = 11 : i64} {
  func.func @_layernorm_kernel(%arg0: i32, %arg1: memref<16x32xf32, #tpu.memory_space<vmem>>, %arg2: memref<1x32xf32, #tpu.memory_space<vmem>>, %arg3: memref<1x32xf32, #tpu.memory_space<vmem>>, %arg4: memref<16x32xbf16, #tpu.memory_space<vmem>>) attributes {dimension_semantics = [#tpu.dimension_semantics<parallel>], iteration_bounds = array<i64: 1>, scalar_prefetch = 0 : i64, scratch_operands = 0 : i64, tpu.core_type = #tpu.core_type<tc>, window_params = [{transform_indices = @transform_0, window_bounds = array<i64: 16, 32>}, {pipeline_mode = #tpu.pipeline_mode<synchronous>, transform_indices = @transform_1, window_bounds = array<i64: 1, 32>}, {pipeline_mode = #tpu.pipeline_mode<synchronous>, transform_indices = @transform_2, window_bounds = array<i64: 1, 32>}, {transform_indices = @transform_3, window_bounds = array<i64: 16, 32>}]} {
    %c0 = arith.constant 0 : index
    %c0_0 = arith.constant 0 : index
    %0 = vector.load %arg1[%c0, %c0_0] : memref<16x32xf32, #tpu.memory_space<vmem>>, vector<16x32xf32>
    %c0_1 = arith.constant 0 : index
    %c0_2 = arith.constant 0 : index
    %1 = vector.load %arg2[%c0_1, %c0_2] : memref<1x32xf32, #tpu.memory_space<vmem>>, vector<1x32xf32>
    %c0_3 = arith.constant 0 : index
    %c0_4 = arith.constant 0 : index
    %2 = vector.load %arg3[%c0_3, %c0_4] : memref<1x32xf32, #tpu.memory_space<vmem>>, vector<1x32xf32>
    %cst = arith.constant dense<0.000000e+00> : vector<16xf32>
    %3 = vector.multi_reduction <add>, %0, %cst [1] : vector<16x32xf32> to vector<16xf32>
    %4 = vector.shape_cast %3 : vector<16xf32> to vector<16x1xf32>
    %cst_5 = arith.constant 3.200000e+01 : f32
    %5 = vector.broadcast %cst_5 : f32 to vector<16x1xf32>
    %6 = arith.divf %4, %5 : vector<16x1xf32>
    %7 = vector.broadcast %6 : vector<16x1xf32> to vector<16x32xf32>
    %8 = arith.subf %0, %7 : vector<16x32xf32>
    %9 = arith.mulf %8, %8 : vector<16x32xf32>
    %cst_6 = arith.constant dense<0.000000e+00> : vector<16xf32>
    %10 = vector.multi_reduction <add>, %9, %cst_6 [1] : vector<16x32xf32> to vector<16xf32>
    %11 = vector.shape_cast %10 : vector<16xf32> to vector<16x1xf32>
    %cst_7 = arith.constant 0.0322580636 : f32
    %12 = vector.broadcast %cst_7 : f32 to vector<16x1xf32>
    %13 = arith.mulf %11, %12 : vector<16x1xf32>
    %14 = vector.broadcast %1 : vector<1x32xf32> to vector<16x32xf32>
    %15 = arith.mulf %14, %8 : vector<16x32xf32>
    %16 = math.sqrt %13 : vector<16x1xf32>
    %cst_8 = arith.constant 9.99999997E-7 : f32
    %17 = vector.broadcast %cst_8 : f32 to vector<16x1xf32>
    %18 = arith.addf %16, %17 : vector<16x1xf32>
    %19 = vector.broadcast %18 : vector<16x1xf32> to vector<16x32xf32>
    %20 = arith.divf %15, %19 : vector<16x32xf32>
    %21 = vector.broadcast %2 : vector<1x32xf32> to vector<16x32xf32>
    %22 = arith.addf %20, %21 : vector<16x32xf32>
    %23 = arith.truncf %22 : vector<16x32xf32> to vector<16x32xbf16>
    %c0_9 = arith.constant 0 : index
    %c0_10 = arith.constant 0 : index
    %24 = vector.load %arg4[%c0_9, %c0_10] : memref<16x32xbf16, #tpu.memory_space<vmem>>, vector<16x32xbf16>
    tpu.vector_store %arg4[%c0_9, %c0_10], %23 {strides = array<i32>} : memref<16x32xbf16, #tpu.memory_space<vmem>>, vector<16x32xbf16>,
    return
  }
  func.func @transform_0(%arg0: i32) -> (i32, i32) {
    %c0_i32 = arith.constant 0 : i32
    %c0_i32_0 = arith.constant 0 : i32
    return %arg0, %c0_i32 : i32, i32
  }
  func.func @transform_1(%arg0: i32) -> (i32, i32) {
    %c0_i32 = arith.constant 0 : i32
    %c0_i32_0 = arith.constant 0 : i32
    %c0_i32_1 = arith.constant 0 : i32
    return %c0_i32, %c0_i32_0 : i32, i32
  }
  func.func @transform_2(%arg0: i32) -> (i32, i32) {
    %c0_i32 = arith.constant 0 : i32
    %c0_i32_0 = arith.constant 0 : i32
    %c0_i32_1 = arith.constant 0 : i32
    return %c0_i32, %c0_i32_0 : i32, i32
  }
  func.func @transform_3(%arg0: i32) -> (i32, i32) {
    %c0_i32 = arith.constant 0 : i32
    %c0_i32_0 = arith.constant 0 : i32
    return %arg0, %c0_i32 : i32, i32
  }
}

module attributes {stable_mosaic.version = 11 : i64} {
  func.func @_proj_lse_kernel(%arg0: i32, %arg1: i32, %arg2: memref<16x32xbf16, #tpu.memory_space<vmem>>, %arg3: memref<32x64xbf16, #tpu.memory_space<vmem>>, %arg4: memref<1x64xf32, #tpu.memory_space<vmem>>, %arg5: memref<16x1xf32, #tpu.memory_space<vmem>>, %arg6: memref<16x1xf32, #tpu.memory_space<vmem>>, %arg7: memref<16x1xf32, #tpu.memory_space<vmem>>) attributes {dimension_semantics = [#tpu.dimension_semantics<parallel>, #tpu.dimension_semantics<arbitrary>], iteration_bounds = array<i64: 1, 1>, scalar_prefetch = 0 : i64, scratch_operands = 2 : i64, tpu.core_type = #tpu.core_type<tc>, window_params = [{transform_indices = @transform_0, window_bounds = array<i64: 16, 32>}, {transform_indices = @transform_1, window_bounds = array<i64: 32, 64>}, {transform_indices = @transform_2, window_bounds = array<i64: 1, 64>}, {transform_indices = @transform_3, window_bounds = array<i64: 16, 1>}]} {
    %c0_i32 = arith.constant 0 : i32
    %0 = arith.cmpi eq, %arg1, %c0_i32 : i32
    %1 = arith.extui %0 : i1 to i32
    %c0_i32_0 = arith.constant 0 : i32
    %2 = arith.cmpi ne, %1, %c0_i32_0 : i32
    scf.if %2 {
      %cst_18 = arith.constant 0xFF800000 : f32
      %28 = vector.broadcast %cst_18 : f32 to vector<16x1xf32>
      %c0_19 = arith.constant 0 : index
      %c0_20 = arith.constant 0 : index
      %29 = vector.load %arg6[%c0_19, %c0_20] : memref<16x1xf32, #tpu.memory_space<vmem>>, vector<16x1xf32>
      tpu.vector_store %arg6[%c0_19, %c0_20], %28 {strides = array<i32>} : memref<16x1xf32, #tpu.memory_space<vmem>>, vector<16x1xf32>,
      %cst_21 = arith.constant 0.000000e+00 : f32
      %30 = vector.broadcast %cst_21 : f32 to vector<16x1xf32>
      %c0_22 = arith.constant 0 : index
      %c0_23 = arith.constant 0 : index
      %31 = vector.load %arg7[%c0_22, %c0_23] : memref<16x1xf32, #tpu.memory_space<vmem>>, vector<16x1xf32>
      tpu.vector_store %arg7[%c0_22, %c0_23], %30 {strides = array<i32>} : memref<16x1xf32, #tpu.memory_space<vmem>>, vector<16x1xf32>,
    } else {
    }
    %c0 = arith.constant 0 : index
    %c0_1 = arith.constant 0 : index
    %3 = vector.load %arg2[%c0, %c0_1] : memref<16x32xbf16, #tpu.memory_space<vmem>>, vector<16x32xbf16>
    %c0_2 = arith.constant 0 : index
    %c0_3 = arith.constant 0 : index
    %4 = vector.load %arg3[%c0_2, %c0_3] : memref<32x64xbf16, #tpu.memory_space<vmem>>, vector<32x64xbf16>
    %cst = arith.constant dense<0.000000e+00> : vector<16x64xf32>
    %5 = tpu.matmul %3, %4, %cst {dimension_numbers = #tpu.dot_dimension_numbers<[1], [0], [0], [1], [0, 0, 1, 1], [], []>} : vector<16x32xbf16>, vector<32x64xbf16>, vector<16x64xf32> -> vector<16x64xf32>
    %c0_4 = arith.constant 0 : index
    %c0_5 = arith.constant 0 : index
    %6 = vector.load %arg4[%c0_4, %c0_5] : memref<1x64xf32, #tpu.memory_space<vmem>>, vector<1x64xf32>
    %7 = vector.broadcast %6 : vector<1x64xf32> to vector<16x64xf32>
    %8 = arith.addf %5, %7 : vector<16x64xf32>
    %c0_6 = arith.constant 0 : index
    %c0_7 = arith.constant 0 : index
    %9 = vector.load %arg6[%c0_6, %c0_7] : memref<16x1xf32, #tpu.memory_space<vmem>>, vector<16x1xf32>
    %cst_8 = arith.constant dense<0xFF800000> : vector<16xf32>
    %10 = vector.multi_reduction <maximumf>, %8, %cst_8 [1] : vector<16x64xf32> to vector<16xf32>
    %11 = vector.shape_cast %10 : vector<16xf32> to vector<16x1xf32>
    %12 = arith.maximumf %9, %11 : vector<16x1xf32>
    %c0_9 = arith.constant 0 : index
    %c0_10 = arith.constant 0 : index
    %13 = vector.load %arg7[%c0_9, %c0_10] : memref<16x1xf32, #tpu.memory_space<vmem>>, vector<16x1xf32>
    %14 = arith.subf %9, %12 : vector<16x1xf32>
    %15 = math.exp %14 : vector<16x1xf32>
    %16 = arith.mulf %13, %15 : vector<16x1xf32>
    %17 = vector.broadcast %12 : vector<16x1xf32> to vector<16x64xf32>
    %18 = arith.subf %8, %17 : vector<16x64xf32>
    %19 = math.exp %18 : vector<16x64xf32>
    %cst_11 = arith.constant dense<0.000000e+00> : vector<16xf32>
    %20 = vector.multi_reduction <add>, %19, %cst_11 [1] : vector<16x64xf32> to vector<16xf32>
    %21 = vector.shape_cast %20 : vector<16xf32> to vector<16x1xf32>
    %22 = arith.addf %16, %21 : vector<16x1xf32>
    %c0_12 = arith.constant 0 : index
    %c0_13 = arith.constant 0 : index
    %23 = vector.load %arg7[%c0_12, %c0_13] : memref<16x1xf32, #tpu.memory_space<vmem>>, vector<16x1xf32>
    tpu.vector_store %arg7[%c0_12, %c0_13], %22 {strides = array<i32>} : memref<16x1xf32, #tpu.memory_space<vmem>>, vector<16x1xf32>,
    %c0_14 = arith.constant 0 : index
    %c0_15 = arith.constant 0 : index
    %24 = vector.load %arg6[%c0_14, %c0_15] : memref<16x1xf32, #tpu.memory_space<vmem>>, vector<16x1xf32>
    tpu.vector_store %arg6[%c0_14, %c0_15], %12 {strides = array<i32>} : memref<16x1xf32, #tpu.memory_space<vmem>>, vector<16x1xf32>,
    %c0_i32_16 = arith.constant 0 : i32
    %25 = arith.cmpi eq, %arg1, %c0_i32_16 : i32
    %26 = arith.extui %25 : i1 to i32
    %c0_i32_17 = arith.constant 0 : i32
    %27 = arith.cmpi ne, %26, %c0_i32_17 : i32
    scf.if %27 {
      %c0_18 = arith.constant 0 : index
      %c0_19 = arith.constant 0 : index
      %28 = vector.load %arg6[%c0_18, %c0_19] : memref<16x1xf32, #tpu.memory_space<vmem>>, vector<16x1xf32>
      %c0_20 = arith.constant 0 : index
      %c0_21 = arith.constant 0 : index
      %29 = vector.load %arg7[%c0_20, %c0_21] : memref<16x1xf32, #tpu.memory_space<vmem>>, vector<16x1xf32>
      %30 = math.log %29 : vector<16x1xf32>
      %31 = arith.addf %28, %30 : vector<16x1xf32>
      %c0_22 = arith.constant 0 : index
      %c0_23 = arith.constant 0 : index
      %32 = vector.load %arg5[%c0_22, %c0_23] : memref<16x1xf32, #tpu.memory_space<vmem>>, vector<16x1xf32>
      tpu.vector_store %arg5[%c0_22, %c0_23], %31 {strides = array<i32>} : memref<16x1xf32, #tpu.memory_space<vmem>>, vector<16x1xf32>,
    } else {
    }
    return
  }
  func.func @transform_0(%arg0: i32, %arg1: i32) -> (i32, i32) {
    %c0_i32 = arith.constant 0 : i32
    %c0_i32_0 = arith.constant 0 : i32
    return %arg0, %c0_i32 : i32, i32
  }
  func.func @transform_1(%arg0: i32, %arg1: i32) -> (i32, i32) {
    %c0_i32 = arith.constant 0 : i32
    %c0_i32_0 = arith.constant 0 : i32
    return %c0_i32, %arg1 : i32, i32
  }
  func.func @transform_2(%arg0: i32, %arg1: i32) -> (i32, i32) {
    %c0_i32 = arith.constant 0 : i32
    %c0_i32_0 = arith.constant 0 : i32
    return %c0_i32, %arg1 : i32, i32
  }
  func.func @transform_3(%arg0: i32, %arg1: i32) -> (i32, i32) {
    %c0_i32 = arith.constant 0 : i32
    %c0_i32_0 = arith.constant 0 : i32
    return %arg0, %c0_i32 : i32, i32
  }
}

module attributes {stable_mosaic.version = 11 : i64} {
  func.func @_proj_sub_kernel(%arg0: i32, %arg1: i32, %arg2: memref<16x32xbf16, #tpu.memory_space<vmem>>, %arg3: memref<32x64xbf16, #tpu.memory_space<vmem>>, %arg4: memref<1x64xf32, #tpu.memory_space<vmem>>, %arg5: memref<16x1xf32, #tpu.memory_space<vmem>>, %arg6: memref<16x64xf32, #tpu.memory_space<vmem>>) attributes {dimension_semantics = [#tpu.dimension_semantics<parallel>, #tpu.dimension_semantics<parallel>], iteration_bounds = array<i64: 1, 1>, scalar_prefetch = 0 : i64, scratch_operands = 0 : i64, tpu.core_type = #tpu.core_type<tc>, window_params = [{transform_indices = @transform_0, window_bounds = array<i64: 16, 32>}, {transform_indices = @transform_1, window_bounds = array<i64: 32, 64>}, {transform_indices = @transform_2, window_bounds = array<i64: 1, 64>}, {transform_indices = @transform_3, window_bounds = array<i64: 16, 1>}, {transform_indices = @transform_4, window_bounds = array<i64: 16, 64>}]} {
    %c0 = arith.constant 0 : index
    %c0_0 = arith.constant 0 : index
    %0 = vector.load %arg2[%c0, %c0_0] : memref<16x32xbf16, #tpu.memory_space<vmem>>, vector<16x32xbf16>
    %c0_1 = arith.constant 0 : index
    %c0_2 = arith.constant 0 : index
    %1 = vector.load %arg3[%c0_1, %c0_2] : memref<32x64xbf16, #tpu.memory_space<vmem>>, vector<32x64xbf16>
    %cst = arith.constant dense<0.000000e+00> : vector<16x64xf32>
    %2 = tpu.matmul %0, %1, %cst {dimension_numbers = #tpu.dot_dimension_numbers<[1], [0], [0], [1], [0, 0, 1, 1], [], []>} : vector<16x32xbf16>, vector<32x64xbf16>, vector<16x64xf32> -> vector<16x64xf32>
    %c0_3 = arith.constant 0 : index
    %c0_4 = arith.constant 0 : index
    %3 = vector.load %arg4[%c0_3, %c0_4] : memref<1x64xf32, #tpu.memory_space<vmem>>, vector<1x64xf32>
    %4 = vector.broadcast %3 : vector<1x64xf32> to vector<16x64xf32>
    %5 = arith.addf %2, %4 : vector<16x64xf32>
    %c0_5 = arith.constant 0 : index
    %c0_6 = arith.constant 0 : index
    %6 = vector.load %arg5[%c0_5, %c0_6] : memref<16x1xf32, #tpu.memory_space<vmem>>, vector<16x1xf32>
    %7 = vector.broadcast %6 : vector<16x1xf32> to vector<16x64xf32>
    %8 = arith.subf %5, %7 : vector<16x64xf32>
    %c0_7 = arith.constant 0 : index
    %c0_8 = arith.constant 0 : index
    %9 = vector.load %arg6[%c0_7, %c0_8] : memref<16x64xf32, #tpu.memory_space<vmem>>, vector<16x64xf32>
    tpu.vector_store %arg6[%c0_7, %c0_8], %8 {strides = array<i32>} : memref<16x64xf32, #tpu.memory_space<vmem>>, vector<16x64xf32>,
    return
  }
  func.func @transform_0(%arg0: i32, %arg1: i32) -> (i32, i32) {
    %c0_i32 = arith.constant 0 : i32
    %c0_i32_0 = arith.constant 0 : i32
    return %arg0, %c0_i32 : i32, i32
  }
  func.func @transform_1(%arg0: i32, %arg1: i32) -> (i32, i32) {
    %c0_i32 = arith.constant 0 : i32
    %c0_i32_0 = arith.constant 0 : i32
    return %c0_i32, %arg1 : i32, i32
  }
  func.func @transform_2(%arg0: i32, %arg1: i32) -> (i32, i32) {
    %c0_i32 = arith.constant 0 : i32
    %c0_i32_0 = arith.constant 0 : i32
    return %c0_i32, %arg1 : i32, i32
  }
  func.func @transform_3(%arg0: i32, %arg1: i32) -> (i32, i32) {
    %c0_i32 = arith.constant 0 : i32
    %c0_i32_0 = arith.constant 0 : i32
    return %arg0, %c0_i32 : i32, i32
  }
  func.func @transform_4(%arg0: i32, %arg1: i32) -> (i32, i32) {
    %c0_i32 = arith.constant 0 : i32
    return %arg0, %arg1 : i32, i32
  }
}

</mosaic_0001>

<bundles_post_ra>
// kernel: gpt2_forward.14
= control target key start
LH: loop header
LB: loop body
LE: loop exit
PB: predicated region body
PF: predicated region fallthrough
CT: control target
= control target key end

     0   :  { %s356_s9 = smov 0   ;;  %s358_s10 = smov 0   ;;  %s380_s0 = inlined_call_operand.vmem [shape: f32[2,8,32], index: 0, kind: input, shape index: {}]   ;;  %s381_s1 = inlined_call_operand.vmem [shape: f32[8,32], index: 1, kind: input, shape index: {}]   ;;  %s382_s2 = inlined_call_operand.vmem [shape: f32[2,8,32], index: 2, kind: output, shape index: {}]  }
   0x1   :  { %s360_s11 = smov 0  }
   0x2 LB: > { %s24_s12 = sadd.s32 1, %s335_s10  ;;  %p288_p0 = scmp.ge.s32.totalorder %s339_s11, 1  ;;  %s339_s11 = sphi %s360_s11, %s12_s11   ;;  %s335_s10 = sphi %s358_s10, %s384_s10   ;;  %s331_s9 = sphi %s356_s9, %s383_s9  }
   0x3   : > { %p26_p1 = scmp.ge.s32.totalorder %s24_s12, 2  ;;  %p139_p2 = scmp.lt.s32.totalorder %s339_s11, 3 }
   0x5   : > { %s386_s12 = smov (%p26_p1, %s24_s12), 0  ;;  %p140_p3 = pnand %p288_p0, %p139_p2 }
   0x6   : > { %p169_p4 = scmp.lt.s32.totalorder (!%p140_p3), %s331_s9, 1 }
   0x7   : > { %143 = sbr.rel (%p140_p3) target bundleno = 21 (0x15), region = 28 }
   0xc   : > { %s388_s9 = smov (!%p169_p4, %s331_s9), 1  ;;  %v189_v1 = vld [vmem:[%s381_s1] sm:$0xff]  ;;  %vm191_vm0 = vcmask 261120  }
   0xd   : > { %s289_s13 = sshll.u32 %s388_s9, 3 }
   0xe   : > { %s175_s16 = scalar_lea.vmem %s380_s0, %s289_s13  ;;  %s186_s21 = scalar_lea.vmem %s382_s2, %s289_s13 }
   0xf   : > { %v187_v0 = vld [vmem:[%s175_s16] sm:$0xff] }
  0x10   : > { %v188_v2 = vmul.f32 5.656854, %v187_v0 }
  0x12   : > { %v190_v3 = vadd.f32 %v189_v1, %v188_v2 }
  0x14   : > { %192 = vst.msk [vmem:[%s186_s21] sm:$0xff] %vm191_vm0, %v190_v3 }
  0x15 PF: > { %s12_s11 = sadd.s32 1, %s339_s11   ;;  %s383_s9 = smov %s335_s10 }
  0x16   : > { %p9_p5 = scmp.ge.s32.totalorder %s12_s11, 4   ;;  %s384_s10 = smov %s386_s12 }
  0x18   :  { %11 = sbr.rel (!%p9_p5) target bundleno = 2 (0x2), region = 61 }

// kernel: gpt2_forward.16
= control target key start
LH: loop header
LB: loop body
LE: loop exit
PB: predicated region body
PF: predicated region fallthrough
CT: control target
= control target key end

     0   :  { %s392_s12 = smov 0   ;;  %s426_s0 = inlined_call_operand.vmem [shape: bf16[8,8,8], index: 0, kind: input, shape index: {}]   ;;  %s427_s1 = inlined_call_operand.vmem [shape: bf16[8,8,8], index: 1, kind: input, shape index: {}]   ;;  %s428_s2 = inlined_call_operand.vmem [shape: bf16[8,8,8], index: 2, kind: input, shape index: {}]   ;;  %s429_s3 = inlined_call_operand.vmem [shape: bf16[8,8,8], index: 3, kind: output, shape index: {}]  }
   0x1 LB: > { %s339_s13 = sadd.s32 4294967295, %s370_s12   ;;  %p343_p0 = scmp.ge.s32.totalorder %s370_s12, 1  ;;  %s370_s12 = sphi %s392_s12, %s13_s12  }
   0x2   : > { %p154_p1 = scmp.lt.s32.totalorder %s370_s12, 9 }
   0x4   : > { %p155_p2 = pnand %p343_p0, %p154_p1 }
   0x5   : > { %p184_p3 = scmp.lt.s32.totalorder (!%p155_p2), %s339_s13, 7 }
   0x6   : > { %158 = sbr.rel (%p155_p2) target bundleno = 539 (0x21b), region = 32 }
   0xb   : > { %s431_s13 = smov (!%p184_p3, %s339_s13), 7  ;;  %vm207_vm0 = vcmask 64512   ;;  %vm242_vm1 = vcmask 1043456   ;;  %vm260_vm2 = vcmask 60416  }
   0xc   : > { %s400_s14 = sshll.u32 %s431_s13, 2 }
   0xd   : > { %s191_s17 = scalar_lea.vmem %s427_s1, %s400_s14  ;;  %s187_s20 = scalar_lea.vmem %s426_s0, %s400_s14 }
   0xe   : > { %v205_v0 = vld [vmem:[%s191_s17] sm:$0xf]  ;;  %s195_s23 = scalar_lea.vmem %s428_s2, %s400_s14  ;;  %s199_s26 = scalar_lea.vmem %s429_s3, %s400_s14 }
   0xf   : > { %v201_v1 = vld [vmem:[%s187_s20] sm:$0xf]  ;;  %v212_v2 = vsel %vm207_vm0, %v205_v0, 0 }
  0x10   : > { %v202_v3 = vunpack.c.l.bf16 %v201_v1  ;;  %221 = vmatpush.bf16.xpose.msra.mxu0 %v212_v2  ;;  %v206_v14 = vld [vmem:[%s195_s23] sm:$0xf] }
  0x11   : > { %v244_v15 = vsel %vm242_vm1, %v206_v14, 0 }
  0x12   : > { %v203_v4 = vmul.f32 0.35351563, %v202_v3  ;;  %253 = vmatpush.bf16.msra.mxu1 %v244_v15 }
  0x14   : > { %v204_v5 = vpack.c.bf16 %v203_v4, %v203_v4 }
  0x17   : > { %348 = vmatmul.msk.bf16.vlgmr.msra.gmra.mxu0 %vm207_vm0, %v204_v5 }
  0x94   : > { %v223_v6 = vpop.f32.mrf.mxu0 }
  0x95   : > { %v227_v7 = vsel %vm207_vm0, %v223_v6, -inf }
  0x96   : > { %228 = vmax.xlane.f32.xlu0 %v227_v7 }
  0x9c   : > { %v225_v8 = vpop.f32.mrf.mxu0 }
 0x109   : > { %v229_v9 = vpop.xlane.xlu0 %228 }
 0x10a   : > { %v230_v10 = vsub.f32 %v223_v6, %v229_v9 }
 0x10c   : > { %v231_v11 = vmul.f32 1.442695, %v230_v10 }
 0x10e   : > { %360 = vpow2.f32 %v231_v11 }
 0x114   : > { %v361_v12 = vpop.eup %360 }
 0x115   : > { %v233_v13 = vsel %vm207_vm0, %v361_v12, 0.0 }
 0x116   : > { %234 = vadd.xlane.f32.xlu0 %v233_v13 }
 0x189   : > { %v235_v16 = vpop.xlane.xlu0 %234 }
 0x18a   : > { %362 = vrcp.f32 %v235_v16 }
 0x190   : > { %v363_v17 = vpop.eup %362 }
 0x191   : > { %v237_v18 = vmul.f32 %v363_v17, %v361_v12 }
 0x193   : > { %v238_v19 = vpack.c.bf16 %v237_v18, %v237_v18 }
 0x195   : > { %349 = vmatmul.msk.bf16.vlgmr.msra.gmra.mxu1 %vm207_vm0, %v238_v19 }
 0x212   : > { %v255_v20 = vpop.f32.mrf.mxu1 }
 0x213   : > { %v259_v21 = vpack.c.bf16 %v255_v20, %v255_v20 }
 0x215   : > { %261 = vst.msk [vmem:[%s199_s26] sm:$0xf] %vm260_vm2, %v259_v21 }
 0x21a   : > { %v257_v22 = vpop.f32.mrf.mxu1 }
 0x21b PF: > { %s13_s12 = sadd.s32 1, %s370_s12  }
 0x21c   : > { %p10_p4 = scmp.ge.s32.totalorder %s13_s12, 10  }
 0x21e   :  { %12 = sbr.rel (!%p10_p4) target bundleno = 1 (0x1), region = 68 }

// kernel: gpt2_forward.15
= control target key start
LH: loop header
LB: loop body
LE: loop exit
PB: predicated region body
PF: predicated region fallthrough
CT: control target
= control target key end

     0   :  { %vm29_vm0 = vcmask 261120   ;;  %v212_v4 = vmov 32.0   ;;  %vm125_vm11 = vcmask 257024   ;;  %vm175_vm15 = vcmask 781312   ;;  %s281_s0 = inlined_call_operand.vmem [shape: f32[16,32], index: 0, kind: input, shape index: {}]   ;;  %s282_s1 = inlined_call_operand.vmem [shape: f32[1,32], index: 1, kind: input, shape index: {}]   ;;  %s283_s2 = inlined_call_operand.vmem [shape: f32[1,32], index: 2, kind: input, shape index: {}]   ;;  %s284_s4 = inlined_call_operand.vmem [shape: f32[1,96], index: 4, kind: input, shape index: {}]   ;;  %s285_s3 = inlined_call_operand.vmem [shape: bf16[32,96], index: 3, kind: input, shape index: {}]   ;;  %s286_s5 = inlined_call_operand.vmem [shape: bf16[16,96], index: 5, kind: output, shape index: {}]  }
   0x1   :  { %v25_v0 = vld [vmem:[%s281_s0] sm:$0xff]  ;;  %v26_v2 = vld [vmem:[%s281_s0 + $0x8] sm:$0xff]  ;;  %202 = vrcp.f32 %v212_v4 }
   0x2   :  { %v30_v1 = vsel %vm29_vm0, %v25_v0, 0.0  ;;  %v33_v3 = vsel %vm29_vm0, %v26_v2, 0.0  ;;  %v199_v12 = vld [vmem:[%s282_s1] ss:$0 sm:$0xff]  ;;  %v197_v36 = vld [vmem:[%s285_s3 + $0x8] sm:$0xff] }
   0x3   :  { %31 = vadd.xlane.f32.xlu0 %v30_v1  ;;  %165 = vmatpush.bf16.msra.mxu0 %v197_v36  ;;  %v196_v40 = vld [vmem:[%s285_s3] sm:$0xff] }
   0x4   :  { %v200_v62 = vld [vmem:[%s283_s2] ss:$0 sm:$0xff] }
   0x7   :  { %v203_v5 = vpop.eup %202  ;;  %166 = vmatpush.bf16.msra.mxu0 %v196_v40 }
   0x8   :  { %v37_v6 = vmul.f32 32.0, %v203_v5  ;;  %vm41_vm1 = vweird.f32 %v203_v5 }
   0xa   :  { %v38_v7 = vsub.f32 1.0, %v37_v6 }
   0xb   :  { %34 = vadd.xlane.f32.xlu0 %v33_v3 }
   0xc   :  { %v39_v8 = vmul.f32 %v203_v5, %v38_v7 }
   0xe   :  { %v40_v9 = vadd.f32 %v203_v5, %v39_v8 }
  0x10   :  { %v42_v10 = vsel %vm41_vm1, %v203_v5, %v40_v9 }
  0x76   :  { %v32_v11 = vpop.xlane.xlu0 %31 }
  0x77   :  { %v43_v13 = vmul.f32 %v42_v10, %v32_v11 }
  0x79   :  { %v45_v14 = vsub.f32 %v25_v0, %v43_v13 }
  0x7b   :  { %v254_v15 = vmul.f32 %v199_v12, %v45_v14  ;;  %v47_v16 = vmul.f32 %v45_v14, %v45_v14 }
  0x7d   :  { %v49_v17 = vsel %vm29_vm0, %v47_v16, 0.0  ;;  %v201_v16 = vld [vmem:[%s284_s4] ss:$0 sm:$0xff] }
  0x7e   :  { %50 = vadd.xlane.f32.xlu1 %v49_v17  ;;  %v35_v18 = vpop.xlane.xlu0 %34 }
  0x7f   :  { %v44_v19 = vmul.f32 %v42_v10, %v35_v18 }
  0x81   :  { %v46_v20 = vsub.f32 %v26_v2, %v44_v19 }
  0x83   :  { %v257_v21 = vmul.f32 %v199_v12, %v46_v20  ;;  %v48_v22 = vmul.f32 %v46_v20, %v46_v20 }
  0x85   :  { %v52_v23 = vsel %vm29_vm0, %v48_v22, 0.0 }
  0x86   :  { %53 = vadd.xlane.f32.xlu1 %v52_v23 }
  0xf1   :  { %v51_v24 = vpop.xlane.xlu1 %50 }
  0xf2   :  { %v55_v25 = vmul.f32 0.032258064, %v51_v24 }
  0xf4   :  { %204 = vrsqrt.f32 %v55_v25  ;;  %vm69_vm2 = vcmp.eq.f32.partialorder %v55_v25, inf  ;;  %v72_v39 = vand.u32 2147483648, %v55_v25  ;;  %vm71_vm3 = vcmp.eq.f32.partialorder %v55_v25, 0.0 }
  0xf9   :  { %v54_v26 = vpop.xlane.xlu1 %53 }
  0xfa   :  { %v205_v27 = vpop.eup %204  ;;  %v56_v28 = vmul.f32 0.032258064, %v54_v26 }
  0xfb   :  { %v63_v29 = vmul.f32 %v205_v27, %v55_v25 }
  0xfc   :  { %206 = vrsqrt.f32 %v56_v28  ;;  %vm81_vm4 = vcmp.eq.f32.partialorder %v56_v28, inf  ;;  %v84_v48 = vand.u32 2147483648, %v56_v28  ;;  %vm83_vm5 = vcmp.eq.f32.partialorder %v56_v28, 0.0 }
  0xfd   :  { %v64_v30 = vmul.f32 %v205_v27, %v63_v29 }
  0xff   :  { %v65_v31 = vmul.f32 0.5, %v64_v30 }
 0x101   :  { %v66_v32 = vsub.f32 1.5, %v65_v31 }
 0x102   :  { %v207_v33 = vpop.eup %206 }
 0x103   :  { %v67_v34 = vmul.f32 %v205_v27, %v66_v32  ;;  %v75_v35 = vmul.f32 %v207_v33, %v56_v28 }
 0x105   :  { %v68_v37 = vmul.f32 %v67_v34, %v55_v25  ;;  %v76_v38 = vmul.f32 %v207_v33, %v75_v35 }
 0x107   :  { %v70_v41 = vsel %vm69_vm2, %v55_v25, %v68_v37  ;;  %v77_v42 = vmul.f32 0.5, %v76_v38 }
 0x108   :  { %v73_v43 = vsel %vm71_vm3, %v72_v39, %v70_v41 }
 0x109   :  { %v86_v44 = vadd.f32 1e-06, %v73_v43  ;;  %v78_v45 = vsub.f32 1.5, %v77_v42 }
 0x10b   :  { %208 = vrcp.f32 %v86_v44  ;;  %v79_v46 = vmul.f32 %v207_v33, %v78_v45  ;;  %v99_v55 = vand.u32 2147483648, %v86_v44  ;;  %v97_v57 = vand.u32 2147483647, %v86_v44 }
 0x10c   :  { %vm93_vm7 = vweird.f32 %v86_v44 }
 0x10d   :  { %v80_v47 = vmul.f32 %v79_v46, %v56_v28  ;;  %v100_v59 = vor.u32 1.1754944e-38, %v99_v55  ;;  %vm98_vm9 = vcmp.eq.f32.partialorder %v97_v57, 8.507059e+37 }
 0x10f   :  { %v82_v49 = vsel %vm81_vm4, %v56_v28, %v80_v47 }
 0x110   :  { %v85_v51 = vsel %vm83_vm5, %v84_v48, %v82_v49 }
 0x111   :  { %v209_v50 = vpop.eup %208  ;;  %v87_v53 = vadd.f32 1e-06, %v85_v51 }
 0x112   :  { %v89_v52 = vmul.f32 %v209_v50, %v86_v44  ;;  %vm94_vm6 = vweird.f32 %v209_v50 }
 0x113   :  { %210 = vrcp.f32 %v87_v53  ;;  %vm95_vm8 = vmor %vm93_vm7, %vm94_vm6  ;;  %v114_v3 = vand.u32 2147483648, %v87_v53  ;;  %v112_v6 = vand.u32 2147483647, %v87_v53  ;;  %vm108_vm12 = vweird.f32 %v87_v53 }
 0x114   :  { %v90_v54 = vsub.f32 1.0, %v89_v52 }
 0x115   :  { %v115_v9 = vor.u32 1.1754944e-38, %v114_v3  ;;  %vm113_vm14 = vcmp.eq.f32.partialorder %v112_v6, 8.507059e+37 }
 0x116   :  { %v91_v56 = vmul.f32 %v209_v50, %v90_v54 }
 0x118   :  { %v92_v58 = vadd.f32 %v209_v50, %v91_v56 }
 0x119   :  { %v211_v60 = vpop.eup %210 }
 0x11a   :  { %v96_v61 = vsel %vm95_vm8, %v209_v50, %v92_v58  ;;  %v104_v63 = vmul.f32 %v211_v60, %v87_v53  ;;  %vm109_vm10 = vweird.f32 %v211_v60 }
 0x11b   :  { %v101_v0 = vsel %vm98_vm9, %v100_v59, %v96_v61  ;;  %vm110_vm13 = vmor %vm108_vm12, %vm109_vm10 }
 0x11c   :  { %v102_v1 = vmul.f32 %v101_v0, %v254_v15  ;;  %v105_v2 = vsub.f32 1.0, %v104_v63 }
 0x11e   :  { %v121_v4 = vadd.f32 %v200_v62, %v102_v1  ;;  %v106_v5 = vmul.f32 %v211_v60, %v105_v2 }
 0x120   :  { %v123_v7 = vpack.c.bf16 %v121_v4, %v121_v4  ;;  %v107_v8 = vadd.f32 %v211_v60, %v106_v5 }
 0x122   :  { %126 = vst.msk [vmem:[#allocation2] sm:$0xf] %vm125_vm11, %v123_v7  ;;  %v111_v10 = vsel %vm110_vm13, %v211_v60, %v107_v8 }
 0x123   :  { %v116_v11 = vsel %vm113_vm14, %v115_v9, %v111_v10 }
 0x124   :  { %v117_v12 = vmul.f32 %v116_v11, %v257_v21 }
 0x126   :  { %v122_v13 = vadd.f32 %v200_v62, %v117_v12 }
 0x128   :  { %v124_v14 = vpack.c.bf16 %v122_v13, %v122_v13 }
 0x12a   :  { %127 = vst.msk [vmem:[#allocation2 + $0x4] sm:$0xf] %vm125_vm11, %v124_v14 }
 0x131   :  { %v195_v15 = vld [vmem:[#allocation2] sm:$0xff] }
 0x132   :  { %194 = vmatmul.msk.bf16.vlgmr.msra.gmra.mxu0 %vm29_vm0, %v195_v15 }
 0x1af   :  { %v168_v17 = vpop.f32.mrf.mxu0 }
 0x1b0   :  { %v169_v18 = vadd.f32 %v201_v16, %v168_v17 }
 0x1b2   :  { %v173_v19 = vpack.c.bf16 %v169_v18, %v169_v18 }
 0x1b4   :  { %176 = vst.msk [vmem:[%s286_s5] sm:$0xf] %vm175_vm15, %v173_v19 }
 0x1b7   :  { %v170_v20 = vpop.f32.mrf.mxu0 }
 0x1b8   :  { %v171_v21 = vadd.f32 %v201_v16, %v170_v20 }
 0x1ba   :  { %v174_v22 = vpack.c.bf16 %v171_v21, %v171_v21 }
 0x1bc   :  { %177 = vst.msk [vmem:[%s286_s5 + $0x4] sm:$0xf] %vm175_vm15, %v174_v22 }

// kernel: gpt2_forward.17
= control target key start
LH: loop header
LB: loop body
LE: loop exit
PB: predicated region body
PF: predicated region fallthrough
CT: control target
= control target key end

     0   :  { %vm22_vm0 = vcmask 261120   ;;  %v111_v1 = vmov 0.0   ;;  %s168_s1 = inlined_call_operand.vmem [shape: bf16[32,32], index: 1, kind: input, shape index: {}]   ;;  %s169_s2 = inlined_call_operand.vmem [shape: f32[1,32], index: 2, kind: input, shape index: {}]   ;;  %s170_s0 = inlined_call_operand.vmem [shape: bf16[16,32], index: 0, kind: input, shape index: {}]   ;;  %s171_s3 = inlined_call_operand.vmem [shape: f32[16,32], index: 3, kind: input, shape index: {}]   ;;  %s172_s4 = inlined_call_operand.vmem [shape: f32[16,32], index: 4, kind: output, shape index: {}]  }
   0x1   :  { %v108_v0 = vld [vmem:[%s168_s1 + $0x8] sm:$0xff]  ;;  %23 = vst.msk [vmem:[#allocation2] sm:$0xff] %vm22_vm0, %v111_v1  ;;  %v107_v2 = vld [vmem:[%s168_s1] sm:$0xff] }
   0x2   :  { %24 = vst.msk [vmem:[#allocation2 + $0x8] sm:$0xff] %vm22_vm0, %v111_v1  ;;  %60 = vmatpush.bf16.msra.mxu0 %v108_v0  ;;  %v106_v3 = vld [vmem:[%s170_s0] sm:$0xff]  ;;  %v84_v16 = vld [vmem:[%s171_s3 + $0x8] sm:$0xff] }
   0x3   :  { %v110_v8 = vld [vmem:[%s169_s2] ss:$0 sm:$0xff] }
   0x4   :  { %v83_v12 = vld [vmem:[%s171_s3] sm:$0xff] }
   0x6   :  { %61 = vmatpush.bf16.msra.mxu0 %v107_v2 }
   0x8   :  { %v25_v4 = vld [vmem:[#allocation2] sm:$0xff] }
   0x9   :  { %105 = vmatmul.msk.bf16.vlgmr.msra.gmra.mxu0 %vm22_vm0, %v106_v3  ;;  %v26_v7 = vld [vmem:[#allocation2 + $0x8] sm:$0xff] }
  0x86   :  { %v63_v5 = vpop.f32.mrf.mxu0 }
  0x87   :  { %v68_v6 = vadd.f32 %v63_v5, %v25_v4 }
  0x89   :  { %70 = vst.msk [vmem:[#allocation2] sm:$0xff] %vm22_vm0, %v68_v6 }
  0x8e   :  { %v65_v9 = vpop.f32.mrf.mxu0 }
  0x8f   :  { %v69_v10 = vadd.f32 %v65_v9, %v26_v7 }
  0x90   :  { %v75_v11 = vld [vmem:[#allocation2] sm:$0xff] }
  0x91   :  { %v81_v13 = vadd.f32 %v110_v8, %v75_v11  ;;  %71 = vst.msk [vmem:[#allocation2 + $0x8] sm:$0xff] %vm22_vm0, %v69_v10 }
  0x93   :  { %v85_v14 = vadd.f32 %v83_v12, %v81_v13 }
  0x95   :  { %87 = vst.msk [vmem:[%s172_s4] sm:$0xff] %vm22_vm0, %v85_v14 }
  0x98   :  { %v76_v15 = vld [vmem:[#allocation2 + $0x8] sm:$0xff] }
  0x99   :  { %v82_v17 = vadd.f32 %v110_v8, %v76_v15 }
  0x9b   :  { %v86_v18 = vadd.f32 %v84_v16, %v82_v17 }
  0x9d   :  { %88 = vst.msk [vmem:[%s172_s4 + $0x8] sm:$0xff] %vm22_vm0, %v86_v18 }

// kernel: gpt2_forward.18
= control target key start
LH: loop header
LB: loop body
LE: loop exit
PB: predicated region body
PF: predicated region fallthrough
CT: control target
= control target key end

     0   :  { %vm29_vm0 = vcmask 261120   ;;  %v214_v4 = vmov 32.0   ;;  %vm125_vm11 = vcmask 257024   ;;  %vm177_vm15 = vcmask 519168   ;;  %s283_s0 = inlined_call_operand.vmem [shape: f32[16,32], index: 0, kind: input, shape index: {}]   ;;  %s284_s1 = inlined_call_operand.vmem [shape: f32[1,32], index: 1, kind: input, shape index: {}]   ;;  %s285_s2 = inlined_call_operand.vmem [shape: f32[1,32], index: 2, kind: input, shape index: {}]   ;;  %s286_s4 = inlined_call_operand.vmem [shape: f32[1,64], index: 4, kind: input, shape index: {}]   ;;  %s287_s3 = inlined_call_operand.vmem [shape: bf16[32,64], index: 3, kind: input, shape index: {}]   ;;  %s288_s5 = inlined_call_operand.vmem [shape: bf16[16,64], index: 5, kind: output, shape index: {}]  }
   0x1   :  { %v25_v0 = vld [vmem:[%s283_s0] sm:$0xff]  ;;  %v26_v2 = vld [vmem:[%s283_s0 + $0x8] sm:$0xff]  ;;  %204 = vrcp.f32 %v214_v4 }
   0x2   :  { %v30_v1 = vsel %vm29_vm0, %v25_v0, 0.0  ;;  %v33_v3 = vsel %vm29_vm0, %v26_v2, 0.0  ;;  %v201_v12 = vld [vmem:[%s284_s1] ss:$0 sm:$0xff]  ;;  %v199_v36 = vld [vmem:[%s287_s3 + $0x8] sm:$0xff] }
   0x3   :  { %31 = vadd.xlane.f32.xlu0 %v30_v1  ;;  %165 = vmatpush.bf16.msra.mxu0 %v199_v36  ;;  %v198_v40 = vld [vmem:[%s287_s3] sm:$0xff] }
   0x4   :  { %v202_v62 = vld [vmem:[%s285_s2] ss:$0 sm:$0xff] }
   0x7   :  { %v205_v5 = vpop.eup %204  ;;  %166 = vmatpush.bf16.msra.mxu0 %v198_v40 }
   0x8   :  { %v37_v6 = vmul.f32 32.0, %v205_v5  ;;  %vm41_vm1 = vweird.f32 %v205_v5 }
   0xa   :  { %v38_v7 = vsub.f32 1.0, %v37_v6 }
   0xb   :  { %34 = vadd.xlane.f32.xlu0 %v33_v3 }
   0xc   :  { %v39_v8 = vmul.f32 %v205_v5, %v38_v7 }
   0xe   :  { %v40_v9 = vadd.f32 %v205_v5, %v39_v8 }
  0x10   :  { %v42_v10 = vsel %vm41_vm1, %v205_v5, %v40_v9 }
  0x76   :  { %v32_v11 = vpop.xlane.xlu0 %31 }
  0x77   :  { %v43_v13 = vmul.f32 %v42_v10, %v32_v11 }
  0x79   :  { %v45_v14 = vsub.f32 %v25_v0, %v43_v13 }
  0x7b   :  { %v256_v15 = vmul.f32 %v201_v12, %v45_v14  ;;  %v47_v16 = vmul.f32 %v45_v14, %v45_v14 }
  0x7d   :  { %v49_v17 = vsel %vm29_vm0, %v47_v16, 0.0  ;;  %v203_v16 = vld [vmem:[%s286_s4] ss:$0 sm:$0xff] }
  0x7e   :  { %50 = vadd.xlane.f32.xlu1 %v49_v17  ;;  %v35_v18 = vpop.xlane.xlu0 %34 }
  0x7f   :  { %v44_v19 = vmul.f32 %v42_v10, %v35_v18 }
  0x81   :  { %v46_v20 = vsub.f32 %v26_v2, %v44_v19 }
  0x83   :  { %v259_v21 = vmul.f32 %v201_v12, %v46_v20  ;;  %v48_v22 = vmul.f32 %v46_v20, %v46_v20 }
  0x85   :  { %v52_v23 = vsel %vm29_vm0, %v48_v22, 0.0 }
  0x86   :  { %53 = vadd.xlane.f32.xlu1 %v52_v23 }
  0xf1   :  { %v51_v24 = vpop.xlane.xlu1 %50 }
  0xf2   :  { %v55_v25 = vmul.f32 0.032258064, %v51_v24 }
  0xf4   :  { %206 = vrsqrt.f32 %v55_v25  ;;  %vm69_vm2 = vcmp.eq.f32.partialorder %v55_v25, inf  ;;  %v72_v39 = vand.u32 2147483648, %v55_v25  ;;  %vm71_vm3 = vcmp.eq.f32.partialorder %v55_v25, 0.0 }
  0xf9   :  { %v54_v26 = vpop.xlane.xlu1 %53 }
  0xfa   :  { %v207_v27 = vpop.eup %206  ;;  %v56_v28 = vmul.f32 0.032258064, %v54_v26 }
  0xfb   :  { %v63_v29 = vmul.f32 %v207_v27, %v55_v25 }
  0xfc   :  { %208 = vrsqrt.f32 %v56_v28  ;;  %vm81_vm4 = vcmp.eq.f32.partialorder %v56_v28, inf  ;;  %v84_v48 = vand.u32 2147483648, %v56_v28  ;;  %vm83_vm5 = vcmp.eq.f32.partialorder %v56_v28, 0.0 }
  0xfd   :  { %v64_v30 = vmul.f32 %v207_v27, %v63_v29 }
  0xff   :  { %v65_v31 = vmul.f32 0.5, %v64_v30 }
 0x101   :  { %v66_v32 = vsub.f32 1.5, %v65_v31 }
 0x102   :  { %v209_v33 = vpop.eup %208 }
 0x103   :  { %v67_v34 = vmul.f32 %v207_v27, %v66_v32  ;;  %v75_v35 = vmul.f32 %v209_v33, %v56_v28 }
 0x105   :  { %v68_v37 = vmul.f32 %v67_v34, %v55_v25  ;;  %v76_v38 = vmul.f32 %v209_v33, %v75_v35 }
 0x107   :  { %v70_v41 = vsel %vm69_vm2, %v55_v25, %v68_v37  ;;  %v77_v42 = vmul.f32 0.5, %v76_v38 }
 0x108   :  { %v73_v43 = vsel %vm71_vm3, %v72_v39, %v70_v41 }
 0x109   :  { %v86_v44 = vadd.f32 1e-06, %v73_v43  ;;  %v78_v45 = vsub.f32 1.5, %v77_v42 }
 0x10b   :  { %210 = vrcp.f32 %v86_v44  ;;  %v79_v46 = vmul.f32 %v209_v33, %v78_v45  ;;  %v99_v55 = vand.u32 2147483648, %v86_v44  ;;  %v97_v57 = vand.u32 2147483647, %v86_v44 }
 0x10c   :  { %vm93_vm7 = vweird.f32 %v86_v44 }
 0x10d   :  { %v80_v47 = vmul.f32 %v79_v46, %v56_v28  ;;  %v100_v59 = vor.u32 1.1754944e-38, %v99_v55  ;;  %vm98_vm9 = vcmp.eq.f32.partialorder %v97_v57, 8.507059e+37 }
 0x10f   :  { %v82_v49 = vsel %vm81_vm4, %v56_v28, %v80_v47 }
 0x110   :  { %v85_v51 = vsel %vm83_vm5, %v84_v48, %v82_v49 }
 0x111   :  { %v211_v50 = vpop.eup %210  ;;  %v87_v53 = vadd.f32 1e-06, %v85_v51 }
 0x112   :  { %v89_v52 = vmul.f32 %v211_v50, %v86_v44  ;;  %vm94_vm6 = vweird.f32 %v211_v50 }
 0x113   :  { %212 = vrcp.f32 %v87_v53  ;;  %vm95_vm8 = vmor %vm93_vm7, %vm94_vm6  ;;  %v114_v3 = vand.u32 2147483648, %v87_v53  ;;  %v112_v6 = vand.u32 2147483647, %v87_v53  ;;  %vm108_vm12 = vweird.f32 %v87_v53 }
 0x114   :  { %v90_v54 = vsub.f32 1.0, %v89_v52 }
 0x115   :  { %v115_v9 = vor.u32 1.1754944e-38, %v114_v3  ;;  %vm113_vm14 = vcmp.eq.f32.partialorder %v112_v6, 8.507059e+37 }
 0x116   :  { %v91_v56 = vmul.f32 %v211_v50, %v90_v54 }
 0x118   :  { %v92_v58 = vadd.f32 %v211_v50, %v91_v56 }
 0x119   :  { %v213_v60 = vpop.eup %212 }
 0x11a   :  { %v96_v61 = vsel %vm95_vm8, %v211_v50, %v92_v58  ;;  %v104_v63 = vmul.f32 %v213_v60, %v87_v53  ;;  %vm109_vm10 = vweird.f32 %v213_v60 }
 0x11b   :  { %v101_v0 = vsel %vm98_vm9, %v100_v59, %v96_v61  ;;  %vm110_vm13 = vmor %vm108_vm12, %vm109_vm10 }
 0x11c   :  { %v102_v1 = vmul.f32 %v101_v0, %v256_v15  ;;  %v105_v2 = vsub.f32 1.0, %v104_v63 }
 0x11e   :  { %v121_v4 = vadd.f32 %v202_v62, %v102_v1  ;;  %v106_v5 = vmul.f32 %v213_v60, %v105_v2 }
 0x120   :  { %v123_v7 = vpack.c.bf16 %v121_v4, %v121_v4  ;;  %v107_v8 = vadd.f32 %v213_v60, %v106_v5 }
 0x122   :  { %126 = vst.msk [vmem:[#allocation2] sm:$0xf] %vm125_vm11, %v123_v7  ;;  %v111_v10 = vsel %vm110_vm13, %v213_v60, %v107_v8 }
 0x123   :  { %v116_v11 = vsel %vm113_vm14, %v115_v9, %v111_v10 }
 0x124   :  { %v117_v12 = vmul.f32 %v116_v11, %v259_v21 }
 0x126   :  { %v122_v13 = vadd.f32 %v202_v62, %v117_v12 }
 0x128   :  { %v124_v14 = vpack.c.bf16 %v122_v13, %v122_v13 }
 0x12a   :  { %127 = vst.msk [vmem:[#allocation2 + $0x4] sm:$0xf] %vm125_vm11, %v124_v14 }
 0x131   :  { %v197_v15 = vld [vmem:[#allocation2] sm:$0xff] }
 0x132   :  { %196 = vmatmul.msk.bf16.vlgmr.msra.gmra.mxu0 %vm29_vm0, %v197_v15 }
 0x1af   :  { %v168_v17 = vpop.f32.mrf.mxu0 }
 0x1b0   :  { %v169_v18 = vadd.f32 %v203_v16, %v168_v17 }
 0x1b2   :  { %v173_v19 = vmax.f32 %v169_v18, 0.0 }
 0x1b4   :  { %v175_v20 = vpack.c.bf16 %v173_v19, %v173_v19 }
 0x1b6   :  { %178 = vst.msk [vmem:[%s288_s5] sm:$0xf] %vm177_vm15, %v175_v20 }
 0x1b7   :  { %v170_v21 = vpop.f32.mrf.mxu0 }
 0x1b8   :  { %v171_v22 = vadd.f32 %v203_v16, %v170_v21 }
 0x1ba   :  { %v174_v23 = vmax.f32 %v171_v22, 0.0 }
 0x1bc   :  { %v176_v24 = vpack.c.bf16 %v174_v23, %v174_v23 }
 0x1be   :  { %179 = vst.msk [vmem:[%s288_s5 + $0x4] sm:$0xf] %vm177_vm15, %v176_v24 }

// kernel: gpt2_forward.19
= control target key start
LH: loop header
LB: loop body
LE: loop exit
PB: predicated region body
PF: predicated region fallthrough
CT: control target
= control target key end

     0   :  { %vm22_vm0 = vcmask 261120   ;;  %v138_v1 = vmov 0.0   ;;  %vm66_vm1 = vcmask 523264   ;;  %s200_s1 = inlined_call_operand.vmem [shape: bf16[64,32], index: 1, kind: input, shape index: {}]   ;;  %s201_s2 = inlined_call_operand.vmem [shape: f32[1,32], index: 2, kind: input, shape index: {}]   ;;  %s202_s0 = inlined_call_operand.vmem [shape: bf16[16,64], index: 0, kind: input, shape index: {}]   ;;  %s203_s3 = inlined_call_operand.vmem [shape: f32[16,32], index: 3, kind: input, shape index: {}]   ;;  %s204_s4 = inlined_call_operand.vmem [shape: f32[16,32], index: 4, kind: output, shape index: {}]  }
   0x1   :  { %v135_v0 = vld [vmem:[%s200_s1 + $0x18] sm:$0xff]  ;;  %23 = vst.msk [vmem:[#allocation2] sm:$0xff] %vm22_vm0, %v138_v1  ;;  %v134_v2 = vld [vmem:[%s200_s1 + $0x10] sm:$0xff]  ;;  %v133_v3 = vld [vmem:[%s200_s1 + $0x8] sm:$0xff] }
   0x2   :  { %24 = vst.msk [vmem:[#allocation2 + $0x8] sm:$0xff] %vm22_vm0, %v138_v1  ;;  %74 = vmatpush.bf16.msra.mxu0 %v135_v0  ;;  %v132_v4 = vld [vmem:[%s200_s1] sm:$0xff]  ;;  %v101_v17 = vld [vmem:[%s203_s3 + $0x8] sm:$0xff] }
   0x3   :  { %v131_v5 = vld [vmem:[%s202_s0] sm:$0xff] }
   0x4   :  { %v137_v10 = vld [vmem:[%s201_s2] ss:$0 sm:$0xff] }
   0x5   :  { %v100_v14 = vld [vmem:[%s203_s3] sm:$0xff] }
   0x6   :  { %75 = vmatpush.bf16.msra.mxu0 %v134_v2 }
   0x8   :  { %v25_v6 = vld [vmem:[#allocation2] sm:$0xff] }
   0x9   :  { %v26_v9 = vld [vmem:[#allocation2 + $0x8] sm:$0xff] }
   0xa   :  { %76 = vmatpush.bf16.msra.mxu0 %v133_v3 }
   0xe   :  { %77 = vmatpush.bf16.msra.mxu0 %v132_v4 }
  0x11   :  { %130 = vmatmul.msk.bf16.vlgmr.msra.gmra.mxu0 %vm66_vm1, %v131_v5 }
  0x8e   :  { %v79_v7 = vpop.f32.mrf.mxu0 }
  0x8f   :  { %v84_v8 = vadd.f32 %v79_v7, %v25_v6 }
  0x91   :  { %87 = vst.msk [vmem:[#allocation2] sm:$0xff] %vm22_vm0, %v84_v8 }
  0x96   :  { %v81_v11 = vpop.f32.mrf.mxu0 }
  0x97   :  { %v85_v12 = vadd.f32 %v81_v11, %v26_v9 }
  0x98   :  { %v92_v13 = vld [vmem:[#allocation2] sm:$0xff] }
  0x99   :  { %v98_v15 = vadd.f32 %v137_v10, %v92_v13  ;;  %88 = vst.msk [vmem:[#allocation2 + $0x8] sm:$0xff] %vm22_vm0, %v85_v12 }
  0x9b   :  { %v102_v16 = vadd.f32 %v100_v14, %v98_v15 }
  0x9d   :  { %104 = vst.msk [vmem:[%s204_s4] sm:$0xff] %vm22_vm0, %v102_v16 }
  0xa0   :  { %v93_v18 = vld [vmem:[#allocation2 + $0x8] sm:$0xff] }
  0xa1   :  { %v99_v19 = vadd.f32 %v137_v10, %v93_v18 }
  0xa3   :  { %v103_v20 = vadd.f32 %v101_v17, %v99_v19 }
  0xa5   :  { %105 = vst.msk [vmem:[%s204_s4 + $0x8] sm:$0xff] %vm22_vm0, %v103_v20 }

// kernel: gpt2_forward.25
= control target key start
LH: loop header
LB: loop body
LE: loop exit
PB: predicated region body
PF: predicated region fallthrough
CT: control target
= control target key end

     0   :  { %vm18_vm0 = vcmask 261120   ;;  %v134_v4 = vmov 32.0   ;;  %vm114_vm10 = vcmask 257024   ;;  %s182_s0 = inlined_call_operand.vmem [shape: f32[16,32], index: 0, kind: input, shape index: {}]   ;;  %s183_s1 = inlined_call_operand.vmem [shape: f32[1,32], index: 1, kind: input, shape index: {}]   ;;  %s184_s2 = inlined_call_operand.vmem [shape: f32[1,32], index: 2, kind: input, shape index: {}]   ;;  %s185_s3 = inlined_call_operand.vmem [shape: bf16[16,32], index: 3, kind: output, shape index: {}]  }
   0x1   :  { %v14_v0 = vld [vmem:[%s182_s0] sm:$0xff]  ;;  %v15_v2 = vld [vmem:[%s182_s0 + $0x8] sm:$0xff]  ;;  %124 = vrcp.f32 %v134_v4 }
   0x2   :  { %v19_v1 = vsel %vm18_vm0, %v14_v0, 0.0  ;;  %v22_v3 = vsel %vm18_vm0, %v15_v2, 0.0  ;;  %v122_v12 = vld [vmem:[%s183_s1] ss:$0 sm:$0xff] }
   0x3   :  { %20 = vadd.xlane.f32.xlu0 %v19_v1  ;;  %v123_v59 = vld [vmem:[%s184_s2] ss:$0 sm:$0xff] }
   0x7   :  { %v125_v5 = vpop.eup %124 }
   0x8   :  { %v26_v6 = vmul.f32 32.0, %v125_v5  ;;  %vm30_vm1 = vweird.f32 %v125_v5 }
   0xa   :  { %v27_v7 = vsub.f32 1.0, %v26_v6 }
   0xb   :  { %23 = vadd.xlane.f32.xlu0 %v22_v3 }
   0xc   :  { %v28_v8 = vmul.f32 %v125_v5, %v27_v7 }
   0xe   :  { %v29_v9 = vadd.f32 %v125_v5, %v28_v8 }
  0x10   :  { %v31_v10 = vsel %vm30_vm1, %v125_v5, %v29_v9 }
  0x76   :  { %v21_v11 = vpop.xlane.xlu0 %20 }
  0x77   :  { %v32_v13 = vmul.f32 %v31_v10, %v21_v11 }
  0x79   :  { %v34_v14 = vsub.f32 %v14_v0, %v32_v13 }
  0x7b   :  { %v49_v15 = vmul.f32 %v122_v12, %v34_v14  ;;  %v36_v16 = vmul.f32 %v34_v14, %v34_v14 }
  0x7d   :  { %v38_v17 = vsel %vm18_vm0, %v36_v16, 0.0 }
  0x7e   :  { %39 = vadd.xlane.f32.xlu1 %v38_v17  ;;  %v24_v18 = vpop.xlane.xlu0 %23 }
  0x7f   :  { %v33_v19 = vmul.f32 %v31_v10, %v24_v18 }
  0x81   :  { %v35_v20 = vsub.f32 %v15_v2, %v33_v19 }
  0x83   :  { %v167_v21 = vmul.f32 %v122_v12, %v35_v20  ;;  %v37_v22 = vmul.f32 %v35_v20, %v35_v20 }
  0x85   :  { %v41_v23 = vsel %vm18_vm0, %v37_v22, 0.0 }
  0x86   :  { %42 = vadd.xlane.f32.xlu1 %v41_v23 }
  0xf1   :  { %v40_v24 = vpop.xlane.xlu1 %39 }
  0xf2   :  { %v44_v25 = vmul.f32 0.032258064, %v40_v24 }
  0xf4   :  { %126 = vrsqrt.f32 %v44_v25  ;;  %vm58_vm2 = vcmp.eq.f32.partialorder %v44_v25, inf  ;;  %v61_v38 = vand.u32 2147483648, %v44_v25  ;;  %vm60_vm3 = vcmp.eq.f32.partialorder %v44_v25, 0.0 }
  0xf9   :  { %v43_v26 = vpop.xlane.xlu1 %42 }
  0xfa   :  { %v127_v27 = vpop.eup %126  ;;  %v45_v28 = vmul.f32 0.032258064, %v43_v26 }
  0xfb   :  { %v52_v29 = vmul.f32 %v127_v27, %v44_v25 }
  0xfc   :  { %128 = vrsqrt.f32 %v45_v28  ;;  %vm70_vm4 = vcmp.eq.f32.partialorder %v45_v28, inf  ;;  %v73_v46 = vand.u32 2147483648, %v45_v28  ;;  %vm72_vm5 = vcmp.eq.f32.partialorder %v45_v28, 0.0 }
  0xfd   :  { %v53_v30 = vmul.f32 %v127_v27, %v52_v29 }
  0xff   :  { %v54_v31 = vmul.f32 0.5, %v53_v30 }
 0x101   :  { %v55_v32 = vsub.f32 1.5, %v54_v31 }
 0x102   :  { %v129_v33 = vpop.eup %128 }
 0x103   :  { %v56_v34 = vmul.f32 %v127_v27, %v55_v32  ;;  %v64_v35 = vmul.f32 %v129_v33, %v45_v28 }
 0x105   :  { %v57_v36 = vmul.f32 %v56_v34, %v44_v25  ;;  %v65_v37 = vmul.f32 %v129_v33, %v64_v35 }
 0x107   :  { %v59_v39 = vsel %vm58_vm2, %v44_v25, %v57_v36  ;;  %v66_v40 = vmul.f32 0.5, %v65_v37 }
 0x108   :  { %v62_v41 = vsel %vm60_vm3, %v61_v38, %v59_v39 }
 0x109   :  { %v75_v42 = vadd.f32 1e-06, %v62_v41  ;;  %v67_v43 = vsub.f32 1.5, %v66_v40 }
 0x10b   :  { %130 = vrcp.f32 %v75_v42  ;;  %v68_v44 = vmul.f32 %v129_v33, %v67_v43  ;;  %v88_v53 = vand.u32 2147483648, %v75_v42  ;;  %v86_v55 = vand.u32 2147483647, %v75_v42 }
 0x10c   :  { %vm82_vm7 = vweird.f32 %v75_v42 }
 0x10d   :  { %v69_v45 = vmul.f32 %v68_v44, %v45_v28  ;;  %v89_v57 = vor.u32 1.1754944e-38, %v88_v53  ;;  %vm87_vm9 = vcmp.eq.f32.partialorder %v86_v55, 8.507059e+37 }
 0x10f   :  { %v71_v47 = vsel %vm70_vm4, %v45_v28, %v69_v45 }
 0x110   :  { %v74_v49 = vsel %vm72_vm5, %v73_v46, %v71_v47 }
 0x111   :  { %v131_v48 = vpop.eup %130  ;;  %v76_v51 = vadd.f32 1e-06, %v74_v49 }
 0x112   :  { %v78_v50 = vmul.f32 %v131_v48, %v75_v42  ;;  %vm83_vm6 = vweird.f32 %v131_v48 }
 0x113   :  { %132 = vrcp.f32 %v76_v51  ;;  %vm84_vm8 = vmor %vm82_vm7, %vm83_vm6  ;;  %v103_v2 = vand.u32 2147483648, %v76_v51  ;;  %v101_v4 = vand.u32 2147483647, %v76_v51  ;;  %vm97_vm12 = vweird.f32 %v76_v51 }
 0x114   :  { %v79_v52 = vsub.f32 1.0, %v78_v50 }
 0x115   :  { %v104_v7 = vor.u32 1.1754944e-38, %v103_v2  ;;  %vm102_vm14 = vcmp.eq.f32.partialorder %v101_v4, 8.507059e+37 }
 0x116   :  { %v80_v54 = vmul.f32 %v131_v48, %v79_v52 }
 0x118   :  { %v81_v56 = vadd.f32 %v131_v48, %v80_v54 }
 0x119   :  { %v133_v58 = vpop.eup %132 }
 0x11a   :  { %v85_v60 = vsel %vm84_vm8, %v131_v48, %v81_v56  ;;  %v93_v62 = vmul.f32 %v133_v58, %v76_v51  ;;  %vm98_vm11 = vweird.f32 %v133_v58 }
 0x11b   :  { %v90_v61 = vsel %vm87_vm9, %v89_v57, %v85_v60  ;;  %vm99_vm13 = vmor %vm97_vm12, %vm98_vm11 }
 0x11c   :  { %v91_v63 = vmul.f32 %v90_v61, %v49_v15  ;;  %v94_v0 = vsub.f32 1.0, %v93_v62 }
 0x11e   :  { %v110_v1 = vadd.f32 %v123_v59, %v91_v63  ;;  %v95_v3 = vmul.f32 %v133_v58, %v94_v0 }
 0x120   :  { %v112_v5 = vpack.c.bf16 %v110_v1, %v110_v1  ;;  %v96_v6 = vadd.f32 %v133_v58, %v95_v3 }
 0x122   :  { %115 = vst.msk [vmem:[%s185_s3] sm:$0xf] %vm114_vm10, %v112_v5  ;;  %v100_v8 = vsel %vm99_vm13, %v133_v58, %v96_v6 }
 0x123   :  { %v105_v9 = vsel %vm102_vm14, %v104_v7, %v100_v8 }
 0x124   :  { %v106_v10 = vmul.f32 %v105_v9, %v167_v21 }
 0x126   :  { %v111_v11 = vadd.f32 %v123_v59, %v106_v10 }
 0x128   :  { %v113_v12 = vpack.c.bf16 %v111_v11, %v111_v11 }
 0x12a   :  { %116 = vst.msk [vmem:[%s185_s3 + $0x4] sm:$0xf] %vm114_vm10, %v113_v12 }

// kernel: gpt2_forward.27
= control target key start
LH: loop header
LB: loop body
LE: loop exit
PB: predicated region body
PF: predicated region fallthrough
CT: control target
= control target key end

     0   :  { %v147_v1 = vmov 0   ;;  %s197_s0 = inlined_call_operand.vmem [shape: bf16[16,32], index: 0, kind: input, shape index: {}]   ;;  %s198_s1 = inlined_call_operand.vmem [shape: bf16[32,64], index: 1, kind: input, shape index: {}]   ;;  %s199_s2 = inlined_call_operand.vmem [shape: f32[1,64], index: 2, kind: input, shape index: {}]   ;;  %s200_s3 = inlined_call_operand.vmem [shape: f32[16,1], index: 3, kind: input, shape index: {}]   ;;  %s201_s4 = inlined_call_operand.hbm [shape: f32[16,64], index: 4, kind: output, shape index: {}]  }
   0x1   :  { %v114_v0 = vld [vmem:[%s198_s1 + $0x8] sm:$0xff]  ;;  %119 = vset.pattern.permute.xlu0 %v147_v1  ;;  %v64_v2 = vld [vmem:[%s200_s3] sm:$0xff] }
   0x2   :  { %56 = vmatpush.bf16.msra.mxu0 %v114_v0  ;;  %v113_v3 = vld [vmem:[%s198_s1] sm:$0xff]  ;;  %68 = vperm.xlu0 %119, %v64_v2  }
   0x3   :  { %9 = vsyncpa [#allocation3], 0  ;;  %v112_v4 = vld [vmem:[%s197_s0] sm:$0xff]  ;;  %vm46_vm0 = vcmask 261120   ;;  %v65_v5 = vld [vmem:[%s200_s3 + $0x8] sm:$0xff]  ;;  %vm78_vm1 = vcmask 523264  }
   0x4   :  { %v120_v6 = vld [vmem:[%s199_s2] ss:$0 sm:$0xff]  ;;  %s148_s1 = smov [#allocation2]   ;;  %s87_s29 = sshll.u32 %s201_s4, 4  ;;  %s88_s29 = int_to_ptr.hbm [resolvable:$true] %s87_s29 }
   0x5   :  { %s85_s0 = sshll.u32 %s148_s1, 4  ;;  %s149_s2 = smov 128   ;;  %s86_s0 = int_to_ptr.vmem [resolvable:$true] %s85_s0 }
   0x6   :  { %57 = vmatpush.bf16.msra.mxu0 %v113_v3  ;;  %s150_s3 = smov 8  }
   0x9   :  { %111 = vmatmul.msk.bf16.vlgmr.msra.gmra.mxu0 %vm46_vm0, %v112_v4 }
   0xa   :  { %73 = vperm.xlu0 %119, %v65_v5  }
  0x74   :  { %v69_v7 = vpop.permute.xlu0 %68 }
  0x7c   :  { %v74_v13 = vpop.permute.xlu0 %73 }
  0x86   :  { %v59_v8 = vpop.f32.mrf.mxu0 }
  0x87   :  { %v60_v9 = vadd.f32 %v120_v6, %v59_v8 }
  0x89   :  { %v76_v10 = vsub.f32 %v60_v9, %v69_v7 }
  0x8b   :  { %79 = vst.msk [vmem:[#allocation2] sm:$0xff] %vm78_vm1, %v76_v10 }
  0x8e   :  { %v61_v11 = vpop.f32.mrf.mxu0 }
  0x8f   :  { %v62_v12 = vadd.f32 %v120_v6, %v61_v11 }
  0x91   :  { %v77_v14 = vsub.f32 %v62_v12, %v74_v13 }
  0x93   :  { %80 = vst.msk [vmem:[#allocation2 + $0x8] sm:$0xff] %vm78_vm1, %v77_v14 }
  0x94   :  { %93 = dma.vmem_to_hbm [thread:$0]  %s86_s0, 256, %s88_s29, [#allocation3], %s149_s2, %s149_s2, %s150_s3  }
  0x95   :  { %145 = dma.done.wait [#allocation3], 256  }
  0x96   :  { %146 = vsyncadd [#allocation3], 4294967040 }
  0x97   :  { %98 = vsyncpa [#allocation3], 1 }

// kernel: gpt2_forward.26
= control target key start
LH: loop header
LB: loop body
LE: loop exit
PB: predicated region body
PF: predicated region fallthrough
CT: control target
= control target key end

     0   :  { %vm51_vm0 = vcmask 261120   ;;  %vm19_vm1 = vcmask 7168   ;;  %v172_v3 = vmov -inf   ;;  %vm71_vm2 = vcmask 523264   ;;  %s227_s1 = inlined_call_operand.vmem [shape: bf16[32,64], index: 1, kind: input, shape index: {}]   ;;  %s228_s2 = inlined_call_operand.vmem [shape: f32[1,64], index: 2, kind: input, shape index: {}]   ;;  %s229_s0 = inlined_call_operand.vmem [shape: bf16[16,32], index: 0, kind: input, shape index: {}]   ;;  %s230_s3 = inlined_call_operand.vmem [shape: f32[16,1], index: 3, kind: output, shape index: {}]  }
   0x1   :  { %v153_v0 = vld [vmem:[%s227_s1 + $0x8] sm:$0xff]  ;;  %v152_v1 = vld [vmem:[%s227_s1] sm:$0xff]  ;;  %20 = vst.msk [vmem:[#allocation2] sm:$0xff] %vm19_vm1, %v172_v3  ;;  %v173_v11 = vmov 0   ;;  %v174_v12 = vmov 0.0  }
   0x2   :  { %61 = vmatpush.bf16.msra.mxu0 %v153_v0  ;;  %v151_v2 = vld [vmem:[%s229_s0] sm:$0xff]  ;;  %21 = vst.msk [vmem:[#allocation2 + $0x8] sm:$0xff] %vm19_vm1, %v172_v3  ;;  %157 = vset.pattern.permute.xlu1 %v173_v11 }
   0x3   :  { %v159_v4 = vld [vmem:[%s228_s2] ss:$0 sm:$0xff]  ;;  %158 = vset.pattern.permute.xlu0 %v173_v11  ;;  %22 = vst.msk [vmem:[#allocation3] sm:$0xff] %vm19_vm1, %v174_v12 }
   0x4   :  { %23 = vst.msk [vmem:[#allocation3 + $0x8] sm:$0xff] %vm19_vm1, %v174_v12 }
   0x6   :  { %62 = vmatpush.bf16.msra.mxu0 %v152_v1 }
   0x8   :  { %v69_v13 = vld [vmem:[#allocation2] sm:$0xff] }
   0x9   :  { %150 = vmatmul.msk.bf16.vlgmr.msra.gmra.mxu0 %vm51_vm0, %v151_v2  ;;  %v70_v17 = vld [vmem:[#allocation2 + $0x8] sm:$0xff] }
   0xa   :  { %v80_v34 = vld [vmem:[#allocation3] sm:$0xff] }
   0xb   :  { %v81_v39 = vld [vmem:[#allocation3 + $0x8] sm:$0xff] }
  0x86   :  { %v64_v5 = vpop.f32.mrf.mxu0 }
  0x87   :  { %v65_v6 = vadd.f32 %v159_v4, %v64_v5 }
  0x89   :  { %v72_v7 = vsel %vm71_vm2, %v65_v6, -inf }
  0x8a   :  { %73 = vmax.xlane.f32.xlu0 %v72_v7 }
  0x8e   :  { %v66_v8 = vpop.f32.mrf.mxu0 }
  0x8f   :  { %v67_v9 = vadd.f32 %v159_v4, %v66_v8 }
  0x91   :  { %v75_v10 = vsel %vm71_vm2, %v67_v9, -inf }
  0x92   :  { %76 = vmax.xlane.f32.xlu0 %v75_v10 }
  0xfd   :  { %v74_v14 = vpop.xlane.xlu0 %73 }
  0xfe   :  { %v78_v15 = vmax.f32 %v69_v13, %v74_v14 }
 0x100   :  { %v82_v16 = vsub.f32 %v69_v13, %v78_v15  ;;  %117 = vst.msk [vmem:[#allocation2] sm:$0xff] %vm19_vm1, %v78_v15  ;;  %92 = vperm.xlu1 %157, %v78_v15  }
 0x102   :  { %v84_v31 = vmul.f32 1.442695, %v82_v16 }
 0x105   :  { %v77_v18 = vpop.xlane.xlu0 %76 }
 0x106   :  { %v79_v19 = vmax.f32 %v70_v17, %v77_v18 }
 0x107   :  { %v122_v47 = vld [vmem:[#allocation2] sm:$0xff] }
 0x108   :  { %v83_v20 = vsub.f32 %v70_v17, %v79_v19  ;;  %118 = vst.msk [vmem:[#allocation2 + $0x8] sm:$0xff] %vm19_vm1, %v79_v19  ;;  %97 = vperm.xlu1 %157, %v79_v19  }
 0x10a   :  { %v86_v32 = vmul.f32 1.442695, %v83_v20 }
 0x10f   :  { %v123_v51 = vld [vmem:[#allocation2 + $0x8] sm:$0xff] }
 0x172   :  { %v93_v21 = vpop.permute.xlu1 %92 }
 0x173   :  { %v100_v22 = vsub.f32 %v65_v6, %v93_v21 }
 0x175   :  { %v102_v23 = vmul.f32 1.442695, %v100_v22 }
 0x177   :  { %160 = vpow2.f32 %v102_v23 }
 0x17a   :  { %v98_v24 = vpop.permute.xlu1 %97 }
 0x17b   :  { %v101_v25 = vsub.f32 %v67_v9, %v98_v24 }
 0x17d   :  { %v161_v26 = vpop.eup %160  ;;  %v104_v27 = vmul.f32 1.442695, %v101_v25 }
 0x17e   :  { %v106_v28 = vsel %vm71_vm2, %v161_v26, 0.0 }
 0x17f   :  { %162 = vpow2.f32 %v104_v27  ;;  %107 = vadd.xlane.f32.xlu2 %v106_v28 }
 0x180   :  { %164 = vpow2.f32 %v84_v31 }
 0x181   :  { %166 = vpow2.f32 %v86_v32 }
 0x185   :  { %v163_v29 = vpop.eup %162 }
 0x186   :  { %v109_v30 = vsel %vm71_vm2, %v163_v29, 0.0  ;;  %v165_v33 = vpop.eup %164 }
 0x187   :  { %110 = vadd.xlane.f32.xlu2 %v109_v30  ;;  %v88_v35 = vmul.f32 %v165_v33, %v80_v34  ;;  %v167_v38 = vpop.eup %166 }
 0x188   :  { %v89_v40 = vmul.f32 %v167_v38, %v81_v39 }
 0x1f2   :  { %v108_v36 = vpop.xlane.xlu2 %107 }
 0x1f3   :  { %v112_v37 = vadd.f32 %v108_v36, %v88_v35 }
 0x1f5   :  { %115 = vst.msk [vmem:[#allocation3] sm:$0xff] %vm19_vm1, %v112_v37 }
 0x1fa   :  { %v111_v41 = vpop.xlane.xlu2 %110 }
 0x1fb   :  { %v113_v42 = vadd.f32 %v111_v41, %v89_v40 }
 0x1fc   :  { %v124_v43 = vld [vmem:[#allocation3] sm:$0xff] }
 0x1fd   :  { %168 = vlog2.f32 %v124_v43  ;;  %116 = vst.msk [vmem:[#allocation3 + $0x8] sm:$0xff] %vm19_vm1, %v113_v42 }
 0x203   :  { %v169_v44 = vpop.eup %168 }
 0x204   :  { %v127_v45 = vmul.f32 0.6931472, %v169_v44  ;;  %v125_v46 = vld [vmem:[#allocation3 + $0x8] sm:$0xff] }
 0x205   :  { %170 = vlog2.f32 %v125_v46 }
 0x206   :  { %v130_v48 = vadd.f32 %v127_v45, %v122_v47 }
 0x208   :  { %132 = vst.msk [vmem:[%s230_s3] sm:$0xff] %vm19_vm1, %v130_v48 }
 0x20b   :  { %v171_v49 = vpop.eup %170 }
 0x20c   :  { %v129_v50 = vmul.f32 0.6931472, %v171_v49 }
 0x20e   :  { %v131_v52 = vadd.f32 %v129_v50, %v123_v51 }
 0x210   :  { %133 = vst.msk [vmem:[%s230_s3 + $0x8] sm:$0xff] %vm19_vm1, %v131_v52 }

</bundles_post_ra>
